<compile_context>
chip_gen: v7x
topology: tpu7x:2x2x1
jax: 0.10.0
libtpu: 0.0.40
codegen_flags: <defaults>
</compile_context>

<pallas_src>
import functools

import jax
import jax.numpy as jnp
import numpy as np
from jax import lax
from jax.experimental import pallas as pl
from jax.experimental.pallas import tpu as pltpu


def _round_up(v, m):
    return (v + m - 1) // m * m


def _replk_kernel(x_ref, bn0s_ref, bn0b_ref,
                  w1_ref, b1_ref,
                  wt_ref, bt_ref,
                  w2_ref, b2_ref,
                  o_ref, pad_ref,
                  *, H, W, Cin, Cdw, K, Wo, RS):
    P = K // 2            # SAME padding of the (merged) large kernel
    Wb = Wo - P           # scratch W column of tap dx = 0
    Hp = H + 2 * P
    Wp = Wo + W + P
    n_strips = H // RS

    # ---- one-time halo zeroing (scratch persists across grid steps; the
    #      interior is fully overwritten each step, halos never touched again).
    #      Safe only because the batch grid axis is "arbitrary" (sequential).
    @pl.when(pl.program_id(0) == 0)
    def _zero_halos():
        if P > 0:
            pad_ref[0:P, :, :] = jnp.zeros((P, Wp, Cdw), jnp.float32)
            pad_ref[P + H:Hp, :, :] = jnp.zeros((P, Wp, Cdw), jnp.float32)
            pad_ref[:, Wo + W:Wp, :] = jnp.zeros((Hp, P, Cdw), jnp.float32)
        if Wo > 0:
            pad_ref[:, 0:Wo, :] = jnp.zeros((Hp, Wo, Cdw), jnp.float32)

    # ---- prelkb_bn + pw1 (1x1 conv + BN + ReLU), bf16 MXU matmul, written
    #      directly into the scratch interior one RS-row strip at a time ----
    @pl.loop(0, n_strips)
    def _pw1(s):
        r0 = pl.multiple_of(s * RS, RS)
        xs = x_ref[pl.ds(r0, RS), :, :].astype(jnp.float32)          # (RS, W, Cin)
        h0 = xs * bn0s_ref[...] + bn0b_ref[...]
        h1 = jnp.dot(h0.reshape(RS * W, Cin).astype(jnp.bfloat16), w1_ref[...],
                     preferred_element_type=jnp.float32)
        h1 = jnp.maximum(h1 + b1_ref[...], 0.0)
        pad_ref[pl.ds(P + r0, RS), Wo:Wo + W, :] = h1.reshape(RS, W, Cdw)

    # ---- merged (reparam) depthwise KxK conv + ReLU + pw2 + residual,
    #      strip-by-strip with a strip-resident f32 accumulator ----
    @pl.loop(0, n_strips)
    def _dw_pw2(s):
        r0 = pl.multiple_of(s * RS, RS)

        def dy_body(dy, acc):
            # one small (K, Cdw) weight-row load per dy; each tap's (Cdw,) row
            # broadcasts implicitly in the multiply (no (K, W, Cdw) slab).
            w_row = wt_ref[pl.ds(dy * K, K), :]                      # (K, Cdw)
            for dx in range(K):                                      # static unroll over dx
                win = pad_ref[pl.ds(r0 + dy, RS), pl.ds(Wb + dx, W), :]
                acc = acc + win * w_row[dx]
            return acc

        acc = lax.fori_loop(0, K, dy_body,
                            jnp.zeros((RS, W, Cdw), jnp.float32))

        # merged bias + lk_nonlinear (ReLU)
        h2 = jnp.maximum(acc + bt_ref[...], 0.0)                     # (RS, W, Cdw)

        # pw2: 1x1 conv + BN (bf16 MXU matmul, f32 accumulate)
        h3 = jnp.dot(h2.reshape(RS * W, Cdw).astype(jnp.bfloat16), w2_ref[...],
                     preferred_element_type=jnp.float32) + b2_ref[...]

        # residual (drop_path == 0.0 -> Identity), one store per strip
        xs = x_ref[pl.ds(r0, RS), :, :].astype(jnp.float32)
        o_ref[pl.ds(r0, RS), :, :] = (xs + h3.reshape(RS, W, Cin)).astype(o_ref.dtype)


def pack_params_for_kernel(p, cin_p, cdw_p):
    """Deploy-time reparam (fold small kernel into large), lane-dense channel
    padding, and bf16 weight layout for the two pointwise MXU matmuls."""
    K = p["wlk"].shape[0]
    SK = p["wsk"].shape[0]
    OFF = (K - SK) // 2

    # Exact RepLKNet merge_kernel(): zero-pad the small kernel into the big one,
    # sum the (BN-fused) biases. Bit-identical to running both convs and adding.
    w_dw = p["wlk"].at[OFF:OFF + SK, OFF:OFF + SK, :].add(p["wsk"])
    b_dw = p["blk"] + p["bsk"]

    def pad_to(a, shape):
        return jnp.pad(a, [(0, s - d) for d, s in zip(a.shape, shape)])

    return {
        "bn0_s": pad_to(p["bn0_s"], (1, cin_p)),
        "bn0_b": pad_to(p["bn0_b"], (1, cin_p)),
        "w1": pad_to(p["w1"], (cin_p, cdw_p)).astype(jnp.bfloat16),
        "b1": pad_to(p["b1"], (1, cdw_p)),
        "wt": pad_to(w_dw, (K, K, cdw_p)).reshape(K * K, cdw_p),
        "bt": pad_to(b_dw, (1, cdw_p)),
        "w2": pad_to(p["w2"], (cdw_p, cin_p)).astype(jnp.bfloat16),
        "b2": pad_to(p["b2"], (1, cin_p)),
    }


def _vmem_capacity_bytes():
    # v7x has 64 MiB per TensorCore; v5e/v6e have 128 MiB. Query if available,
    # otherwise fall back to the smallest (safe everywhere).
    try:
        info = pltpu.get_tpu_info()
        for attr in ("vmem_capacity_bytes", "vmem_bytes", "vmem_size_bytes"):
            v = getattr(info, attr, None)
            if v:
                return int(v)
    except Exception:
        pass
    return 64 * 1024 * 1024


def replk_block_nhwc(x_nhwc, p):
    B, H, W, Cin = x_nhwc.shape
    Cdw = p["w1"].shape[1]
    K = p["wlk"].shape[0]
    P = K // 2
    Cin_p = _round_up(Cin, 128)      # lane-dense channel padding
    Cdw_p = _round_up(Cdw, 128)
    Wo = _round_up(P, 8)             # sublane-aligned interior W offset in scratch
    RS = next(d for d in range(8, 0, -1) if H % d == 0)   # row-strip height (<= 8)

    kp = pack_params_for_kernel(p, Cin_p, Cdw_p)
    x_p = jnp.pad(x_nhwc, ((0, 0), (0, 0), (0, 0), (0, Cin_p - Cin)))

    kern = functools.partial(_replk_kernel, H=H, W=W, Cin=Cin_p, Cdw=Cdw_p,
                             K=K, Wo=Wo, RS=RS)

    args = (x_p, kp["bn0_s"], kp["bn0_b"], kp["w1"], kp["b1"],
            kp["wt"], kp["bt"], kp["w2"], kp["b2"])

    def full_spec(a):
        return pl.BlockSpec(a.shape, lambda b, nd=a.ndim: (0,) * nd)

    # Leading batch dim squeezed -> kernel refs are (H, W, C).
    io_spec = pl.BlockSpec((None, H, W, Cin_p), lambda b: (b, 0, 0, 0))
    in_specs = [io_spec] + [full_spec(a) for a in args[1:]]

    Hp, Wp = H + 2 * P, Wo + W + P
    scratch_shape = (Hp, Wp, Cdw_p)

    # VMEM budget: double-buffered in/out blocks + params + halo scratch +
    # per-strip in-kernel temporaries, with headroom, capped below physical VMEM.
    blk_bytes = H * W * Cin_p * x_nhwc.dtype.itemsize
    param_bytes = sum(int(np.prod(a.shape)) * a.dtype.itemsize for a in args[1:])
    scratch_bytes = int(np.prod(scratch_shape)) * 4
    strip_bytes = RS * W * (4 * Cdw_p + 3 * Cin_p) * 4   # acc/h2/window + x/h3 strips
    need = 2 * 2 * blk_bytes + param_bytes + scratch_bytes + strip_bytes
    budget_cap = int(0.85 * _vmem_capacity_bytes())       # leave compiler headroom
    vmem_limit = int(min(max(2 * need, 32 * 1024 * 1024), budget_cap))

    flops = 2 * B * H * W * (Cin_p * Cdw_p + K * K * Cdw_p + Cdw_p * Cin_p)
    bytes_accessed = 2 * B * blk_bytes + param_bytes

    out = pl.pallas_call(
        kern,
        out_shape=jax.ShapeDtypeStruct((B, H, W, Cin_p), x_nhwc.dtype),
        grid_spec=pltpu.PrefetchScalarGridSpec(
            num_scalar_prefetch=0,
            grid=(B,),
            in_specs=in_specs,
            out_specs=pl.BlockSpec((None, H, W, Cin_p), lambda b: (b, 0, 0, 0)),
            scratch_shapes=[pltpu.VMEM(scratch_shape, jnp.float32)],
        ),
        compiler_params=pltpu.CompilerParams(
            # "arbitrary": the once-only halo zeroing (pl.when(pid == 0)) relies on
            # the batch axis running sequentially on a single core.
            dimension_semantics=("arbitrary",),
            vmem_limit_bytes=vmem_limit,
        ),
        cost_estimate=pl.CostEstimate(flops=flops, transcendentals=0,
                                      bytes_accessed=bytes_accessed),
    )(*args)
    return out[..., :Cin]


# ----------------------- parameter construction (glue) -----------------------

def _fuse_bn(gamma, beta, mean, var, eps=1e-5):
    std = jnp.sqrt(var + eps)
    scale = gamma / std
    shift = beta - mean * scale
    return scale, shift


def make_params(key, in_ch, dw_ch, lk, sk):
    ks = jax.random.split(key, 20)
    u = lambda k, shape, s=0.2: jax.random.uniform(k, shape, jnp.float32, -s, s)
    pos = lambda k, shape: jax.random.uniform(k, shape, jnp.float32, 0.5, 1.5)

    # prelkb_bn
    bn0_s, bn0_b = _fuse_bn(pos(ks[0], (in_ch,)), u(ks[1], (in_ch,)),
                            u(ks[2], (in_ch,)), pos(ks[3], (in_ch,)))
    # pw1: conv (dw_ch, in_ch, 1, 1) -> (in_ch, dw_ch), BN(dw_ch)
    w1 = u(ks[4], (in_ch, dw_ch), 0.5)
    s1, b1 = _fuse_bn(pos(ks[5], (dw_ch,)), u(ks[6], (dw_ch,)),
                      u(ks[7], (dw_ch,)), pos(ks[8], (dw_ch,)))
    # large depthwise: (dw_ch, 1, K, K) -> (K, K, dw_ch), BN(dw_ch)
    wlk = u(ks[9], (lk, lk, dw_ch), 0.3)
    slk, blk = _fuse_bn(pos(ks[10], (dw_ch,)), u(ks[11], (dw_ch,)),
                        u(ks[12], (dw_ch,)), pos(ks[13], (dw_ch,)))
    # small depthwise
    wsk = u(ks[14], (sk, sk, dw_ch), 0.3)
    ssk, bsk = _fuse_bn(pos(ks[15], (dw_ch,)), u(ks[16], (dw_ch,)),
                        u(ks[17], (dw_ch,)), pos(ks[18], (dw_ch,)))
    # pw2: conv (in_ch, dw_ch, 1, 1) -> (dw_ch, in_ch), BN(in_ch)
    w2 = u(ks[19], (dw_ch, in_ch), 0.5)
    k2 = jax.random.split(ks[19], 5)
    s2, b2 = _fuse_bn(pos(k2[0], (in_ch,)), u(k2[1], (in_ch,)),
                      u(k2[2], (in_ch,)), pos(k2[3], (in_ch,)))

    return {
        "bn0_s": bn0_s.reshape(1, in_ch), "bn0_b": bn0_b.reshape(1, in_ch),
        "w1": w1 * s1[None, :], "b1": b1.reshape(1, dw_ch),
        "wlk": wlk * slk[None, None, :], "blk": blk.reshape(1, dw_ch),
        "wsk": wsk * ssk[None, None, :], "bsk": bsk.reshape(1, dw_ch),
        "w2": w2 * s2[None, :], "b2": b2.reshape(1, in_ch),
    }


# ----------------------------- pure-JAX reference -----------------------------

def reference_nhwc(x, p):
    Cdw = p["w1"].shape[1]
    dn = ("NHWC", "HWIO", "NHWC")
    h0 = x * p["bn0_s"] + p["bn0_b"]
    h1 = jax.nn.relu(jnp.einsum("bhwc,cd->bhwd", h0, p["w1"]) + p["b1"])
    lk = lax.conv_general_dilated(h1, p["wlk"][:, :, None, :], (1, 1), "SAME",
                                  dimension_numbers=dn, feature_group_count=Cdw) + p["blk"]
    sk = lax.conv_general_dilated(h1, p["wsk"][:, :, None, :], (1, 1), "SAME",
                                  dimension_numbers=dn, feature_group_count=Cdw) + p["bsk"]
    h2 = jax.nn.relu(lk + sk)
    h3 = jnp.einsum("bhwd,dc->bhwc", h2, p["w2"]) + p["b2"]
    return x + h3


if __name__ == "__main__":
    B, Cin, H, W = 2, 4, 16, 16
    Cdw, LK, SK = 8, 7, 3            # dw_channels, block_lk_size, small_kernel

    key = jax.random.PRNGKey(0)
    kx, kp = jax.random.split(key)
    x_nchw = jax.random.normal(kx, (B, Cin, H, W), jnp.float32)   # PyTorch layout
    params = make_params(kp, Cin, Cdw, LK, SK)

    x_nhwc = jnp.transpose(x_nchw, (0, 2, 3, 1))
    y_nhwc = replk_block_nhwc(x_nhwc, params)
    y_nchw = jnp.transpose(y_nhwc, (0, 3, 1, 2))
    jax.block_until_ready(y_nchw)

    ref = jnp.transpose(reference_nhwc(x_nhwc, params), (0, 3, 1, 2))
    # bf16 operands on the MXU (f32 accumulation) -> bf16-appropriate tolerances.
    np.testing.assert_allclose(np.asarray(y_nchw), np.asarray(ref),
                               rtol=5e-2, atol=1e-1)
    print("KERNEL_OK")
</pallas_src>

<mosaic_0001>
module attributes {stable_mosaic.version = 11 : i64} {
  func.func @_replk_kernel(%arg0: i32, %arg1: memref<1x16x16x128xf32, #tpu.memory_space<vmem>>, %arg2: memref<1x128xf32, #tpu.memory_space<vmem>>, %arg3: memref<1x128xf32, #tpu.memory_space<vmem>>, %arg4: memref<128x128xbf16, #tpu.memory_space<vmem>>, %arg5: memref<1x128xf32, #tpu.memory_space<vmem>>, %arg6: memref<49x128xf32, #tpu.memory_space<vmem>>, %arg7: memref<1x128xf32, #tpu.memory_space<vmem>>, %arg8: memref<128x128xbf16, #tpu.memory_space<vmem>>, %arg9: memref<1x128xf32, #tpu.memory_space<vmem>>, %arg10: memref<1x16x16x128xf32, #tpu.memory_space<vmem>>, %arg11: memref<22x27x128xf32, #tpu.memory_space<vmem>>) attributes {dimension_semantics = [#tpu.dimension_semantics<arbitrary>], iteration_bounds = array<i64: 2>, scalar_prefetch = 0 : i64, scratch_operands = 1 : i64, tpu.core_type = #tpu.core_type<tc>, window_params = [{transform_indices = @transform_0, window_bounds = array<i64: 1, 16, 16, 128>}, {pipeline_mode = #tpu.pipeline_mode<synchronous>, transform_indices = @transform_1, window_bounds = array<i64: 1, 128>}, {pipeline_mode = #tpu.pipeline_mode<synchronous>, transform_indices = @transform_2, window_bounds = array<i64: 1, 128>}, {pipeline_mode = #tpu.pipeline_mode<synchronous>, transform_indices = @transform_3, window_bounds = array<i64: 128, 128>}, {pipeline_mode = #tpu.pipeline_mode<synchronous>, transform_indices = @transform_4, window_bounds = array<i64: 1, 128>}, {pipeline_mode = #tpu.pipeline_mode<synchronous>, transform_indices = @transform_5, window_bounds = array<i64: 49, 128>}, {pipeline_mode = #tpu.pipeline_mode<synchronous>, transform_indices = @transform_6, window_bounds = array<i64: 1, 128>}, {pipeline_mode = #tpu.pipeline_mode<synchronous>, transform_indices = @transform_7, window_bounds = array<i64: 128, 128>}, {pipeline_mode = #tpu.pipeline_mode<synchronous>, transform_indices = @transform_8, window_bounds = array<i64: 1, 128>}, {transform_indices = @transform_9, window_bounds = array<i64: 1, 16, 16, 128>}]} {
    %c0_i32 = arith.constant 0 : i32
    %0 = arith.cmpi eq, %arg0, %c0_i32 : i32
    %1 = arith.extui %0 : i1 to i32
    %c0_i32_0 = arith.constant 0 : i32
    %2 = arith.cmpi ne, %1, %c0_i32_0 : i32
    scf.if %2 {
      %cst = arith.constant 0.000000e+00 : f32
      %5 = vector.broadcast %cst : f32 to vector<3x27x128xf32>
      %c0 = arith.constant 0 : index
      %c0_7 = arith.constant 0 : index
      %c0_8 = arith.constant 0 : index
      %6 = vector.load %arg11[%c0, %c0_7, %c0_8] : memref<22x27x128xf32, #tpu.memory_space<vmem>>, vector<3x27x128xf32>
      tpu.vector_store %arg11[%c0, %c0_7, %c0_8], %5 {strides = array<i32>} : memref<22x27x128xf32, #tpu.memory_space<vmem>>, vector<3x27x128xf32>,
      %cst_9 = arith.constant 0.000000e+00 : f32
      %7 = vector.broadcast %cst_9 : f32 to vector<3x27x128xf32>
      %c19 = arith.constant 19 : index
      %c0_10 = arith.constant 0 : index
      %c0_11 = arith.constant 0 : index
      %8 = vector.load %arg11[%c19, %c0_10, %c0_11] : memref<22x27x128xf32, #tpu.memory_space<vmem>>, vector<3x27x128xf32>
      tpu.vector_store %arg11[%c19, %c0_10, %c0_11], %7 {strides = array<i32>} : memref<22x27x128xf32, #tpu.memory_space<vmem>>, vector<3x27x128xf32>,
      %cst_12 = arith.constant 0.000000e+00 : f32
      %9 = vector.broadcast %cst_12 : f32 to vector<22x3x128xf32>
      %c0_13 = arith.constant 0 : index
      %c24 = arith.constant 24 : index
      %c0_14 = arith.constant 0 : index
      %10 = vector.load %arg11[%c0_13, %c24, %c0_14] : memref<22x27x128xf32, #tpu.memory_space<vmem>>, vector<22x3x128xf32>
      tpu.vector_store %arg11[%c0_13, %c24, %c0_14], %9 {strides = array<i32>} : memref<22x27x128xf32, #tpu.memory_space<vmem>>, vector<22x3x128xf32>,
      %cst_15 = arith.constant 0.000000e+00 : f32
      %11 = vector.broadcast %cst_15 : f32 to vector<22x8x128xf32>
      %c0_16 = arith.constant 0 : index
      %c0_17 = arith.constant 0 : index
      %c0_18 = arith.constant 0 : index
      %12 = vector.load %arg11[%c0_16, %c0_17, %c0_18] : memref<22x27x128xf32, #tpu.memory_space<vmem>>, vector<22x8x128xf32>
      tpu.vector_store %arg11[%c0_16, %c0_17, %c0_18], %11 {strides = array<i32>} : memref<22x27x128xf32, #tpu.memory_space<vmem>>, vector<22x8x128xf32>,
    } else {
    }
    %c0_i32_1 = arith.constant 0 : i32
    %c2_i32 = arith.constant 2 : i32
    %3 = arith.addi %c0_i32_1, %c2_i32 : i32
    %c1_i32 = arith.constant 1 : i32
    scf.for %arg12 = %c0_i32_1 to %3 step %c1_i32  : i32 {
      %c1_i32_7 = arith.constant 1 : i32
      %5 = arith.muli %arg12, %c1_i32_7 : i32
      %c0_i32_8 = arith.constant 0 : i32
      %6 = arith.addi %c0_i32_8, %5 : i32
      %c8_i32 = arith.constant 8 : i32
      %7 = arith.muli %6, %c8_i32 : i32
      %8 = tpu.assume_multiple %7, 8 : i32
      %c0 = arith.constant 0 : index
      %9 = arith.index_cast %8 : i32 to index
      %c0_9 = arith.constant 0 : index
      %c0_10 = arith.constant 0 : index
      %10 = vector.load %arg1[%c0, %9, %c0_9, %c0_10] : memref<1x16x16x128xf32, #tpu.memory_space<vmem>>, vector<1x8x16x128xf32>
      %11 = vector.shape_cast %10 : vector<1x8x16x128xf32> to vector<8x16x128xf32>
      %c0_11 = arith.constant 0 : index
      %c0_12 = arith.constant 0 : index
      %12 = vector.load %arg2[%c0_11, %c0_12] : memref<1x128xf32, #tpu.memory_space<vmem>>, vector<1x128xf32>
      %13 = vector.shape_cast %12 : vector<1x128xf32> to vector<1x1x128xf32>
      %14 = vector.broadcast %13 : vector<1x1x128xf32> to vector<8x16x128xf32>
      %15 = arith.mulf %11, %14 : vector<8x16x128xf32>
      %c0_13 = arith.constant 0 : index
      %c0_14 = arith.constant 0 : index
      %16 = vector.load %arg3[%c0_13, %c0_14] : memref<1x128xf32, #tpu.memory_space<vmem>>, vector<1x128xf32>
      %17 = vector.shape_cast %16 : vector<1x128xf32> to vector<1x1x128xf32>
      %18 = vector.broadcast %17 : vector<1x1x128xf32> to vector<8x16x128xf32>
      %19 = arith.addf %15, %18 : vector<8x16x128xf32>
      %20 = vector.shape_cast %19 : vector<8x16x128xf32> to vector<128x128xf32>
      %21 = arith.truncf %20 : vector<128x128xf32> to vector<128x128xbf16>
      %c0_15 = arith.constant 0 : index
      %c0_16 = arith.constant 0 : index
      %22 = vector.load %arg4[%c0_15, %c0_16] : memref<128x128xbf16, #tpu.memory_space<vmem>>, vector<128x128xbf16>
      %cst = arith.constant dense<0.000000e+00> : vector<128x128xf32>
      %23 = tpu.matmul %21, %22, %cst {dimension_numbers = #tpu.dot_dimension_numbers<[1], [0], [0], [1], [0, 0, 1, 1], [], []>} : vector<128x128xbf16>, vector<128x128xbf16>, vector<128x128xf32> -> vector<128x128xf32>
      %c0_17 = arith.constant 0 : index
      %c0_18 = arith.constant 0 : index
      %24 = vector.load %arg5[%c0_17, %c0_18] : memref<1x128xf32, #tpu.memory_space<vmem>>, vector<1x128xf32>
      %25 = vector.broadcast %24 : vector<1x128xf32> to vector<128x128xf32>
      %26 = arith.addf %23, %25 : vector<128x128xf32>
      %cst_19 = arith.constant 0.000000e+00 : f32
      %27 = vector.broadcast %cst_19 : f32 to vector<128x128xf32>
      %28 = arith.maximumf %26, %27 : vector<128x128xf32>
      %29 = vector.shape_cast %28 : vector<128x128xf32> to vector<8x16x128xf32>
      %c3_i32 = arith.constant 3 : i32
      %30 = arith.addi %c3_i32, %8 : i32
      %31 = arith.index_cast %30 : i32 to index
      %c8 = arith.constant 8 : index
      %c0_20 = arith.constant 0 : index
      %32 = vector.load %arg11[%31, %c8, %c0_20] : memref<22x27x128xf32, #tpu.memory_space<vmem>>, vector<8x16x128xf32>
      tpu.vector_store %arg11[%31, %c8, %c0_20], %29 {strides = array<i32>} : memref<22x27x128xf32, #tpu.memory_space<vmem>>, vector<8x16x128xf32>,
    }
    %c2_i32_2 = arith.constant 2 : i32
    %c0_i32_3 = arith.constant 0 : i32
    %c2_i32_4 = arith.constant 2 : i32
    %4 = arith.addi %c0_i32_3, %c2_i32_4 : i32
    %c1_i32_5 = arith.constant 1 : i32
    scf.for %arg12 = %c0_i32_3 to %4 step %c1_i32_5  : i32 {
      %c1_i32_7 = arith.constant 1 : i32
      %5 = arith.muli %arg12, %c1_i32_7 : i32
      %c0_i32_8 = arith.constant 0 : i32
      %6 = arith.addi %c0_i32_8, %5 : i32
      %c8_i32 = arith.constant 8 : i32
      %7 = arith.muli %6, %c8_i32 : i32
      %8 = tpu.assume_multiple %7, 8 : i32
      %cst = arith.constant 0.000000e+00 : f32
      %9 = vector.broadcast %cst : f32 to vector<8x16x128xf32>
      %c0_i32_9 = arith.constant 0 : i32
      %c7_i32 = arith.constant 7 : i32
      %10 = arith.addi %c0_i32_9, %c7_i32 : i32
      %c1_i32_10 = arith.constant 1 : i32
      %11 = scf.for %arg13 = %c0_i32_9 to %10 step %c1_i32_10 iter_args(%arg14 = %9) -> (vector<8x16x128xf32>)  : i32 {
        %c7_i32_25 = arith.constant 7 : i32
        %34 = arith.muli %arg13, %c7_i32_25 : i32
        %35 = arith.index_cast %34 : i32 to index
        %c0_26 = arith.constant 0 : index
        %36 = vector.load %arg6[%35, %c0_26] : memref<49x128xf32, #tpu.memory_space<vmem>>, vector<7x128xf32>
        %37 = arith.addi %8, %arg13 : i32
        %38 = arith.index_cast %37 : i32 to index
        %c5 = arith.constant 5 : index
        %c0_27 = arith.constant 0 : index
        %39 = vector.load %arg11[%38, %c5, %c0_27] : memref<22x27x128xf32, #tpu.memory_space<vmem>>, vector<8x16x128xf32>
        %40 = vector.extract_strided_slice %36 {offsets = [0, 0], sizes = [1, 128], strides = [1, 1]} : vector<7x128xf32> to vector<1x128xf32>
        %41 = vector.shape_cast %40 : vector<1x128xf32> to vector<128xf32>
        %42 = vector.shape_cast %41 : vector<128xf32> to vector<1x1x128xf32>
        %43 = vector.broadcast %42 : vector<1x1x128xf32> to vector<8x16x128xf32>
        %44 = arith.mulf %39, %43 : vector<8x16x128xf32>
        %45 = arith.addf %arg14, %44 : vector<8x16x128xf32>
        %46 = arith.addi %8, %arg13 : i32
        %47 = arith.index_cast %46 : i32 to index
        %c6 = arith.constant 6 : index
        %c0_28 = arith.constant 0 : index
        %48 = vector.load %arg11[%47, %c6, %c0_28] : memref<22x27x128xf32, #tpu.memory_space<vmem>>, vector<8x16x128xf32>
        %49 = vector.extract_strided_slice %36 {offsets = [1, 0], sizes = [1, 128], strides = [1, 1]} : vector<7x128xf32> to vector<1x128xf32>
        %50 = vector.shape_cast %49 : vector<1x128xf32> to vector<128xf32>
        %51 = vector.shape_cast %50 : vector<128xf32> to vector<1x1x128xf32>
        %52 = vector.broadcast %51 : vector<1x1x128xf32> to vector<8x16x128xf32>
        %53 = arith.mulf %48, %52 : vector<8x16x128xf32>
        %54 = arith.addf %45, %53 : vector<8x16x128xf32>
        %55 = arith.addi %8, %arg13 : i32
        %56 = arith.index_cast %55 : i32 to index
        %c7 = arith.constant 7 : index
        %c0_29 = arith.constant 0 : index
        %57 = vector.load %arg11[%56, %c7, %c0_29] : memref<22x27x128xf32, #tpu.memory_space<vmem>>, vector<8x16x128xf32>
        %58 = vector.extract_strided_slice %36 {offsets = [2, 0], sizes = [1, 128], strides = [1, 1]} : vector<7x128xf32> to vector<1x128xf32>
        %59 = vector.shape_cast %58 : vector<1x128xf32> to vector<128xf32>
        %60 = vector.shape_cast %59 : vector<128xf32> to vector<1x1x128xf32>
        %61 = vector.broadcast %60 : vector<1x1x128xf32> to vector<8x16x128xf32>
        %62 = arith.mulf %57, %61 : vector<8x16x128xf32>
        %63 = arith.addf %54, %62 : vector<8x16x128xf32>
        %64 = arith.addi %8, %arg13 : i32
        %65 = arith.index_cast %64 : i32 to index
        %c8 = arith.constant 8 : index
        %c0_30 = arith.constant 0 : index
        %66 = vector.load %arg11[%65, %c8, %c0_30] : memref<22x27x128xf32, #tpu.memory_space<vmem>>, vector<8x16x128xf32>
        %67 = vector.extract_strided_slice %36 {offsets = [3, 0], sizes = [1, 128], strides = [1, 1]} : vector<7x128xf32> to vector<1x128xf32>
        %68 = vector.shape_cast %67 : vector<1x128xf32> to vector<128xf32>
        %69 = vector.shape_cast %68 : vector<128xf32> to vector<1x1x128xf32>
        %70 = vector.broadcast %69 : vector<1x1x128xf32> to vector<8x16x128xf32>
        %71 = arith.mulf %66, %70 : vector<8x16x128xf32>
        %72 = arith.addf %63, %71 : vector<8x16x128xf32>
        %73 = arith.addi %8, %arg13 : i32
        %74 = arith.index_cast %73 : i32 to index
        %c9 = arith.constant 9 : index
        %c0_31 = arith.constant 0 : index
        %75 = vector.load %arg11[%74, %c9, %c0_31] : memref<22x27x128xf32, #tpu.memory_space<vmem>>, vector<8x16x128xf32>
        %76 = vector.extract_strided_slice %36 {offsets = [4, 0], sizes = [1, 128], strides = [1, 1]} : vector<7x128xf32> to vector<1x128xf32>
        %77 = vector.shape_cast %76 : vector<1x128xf32> to vector<128xf32>
        %78 = vector.shape_cast %77 : vector<128xf32> to vector<1x1x128xf32>
        %79 = vector.broadcast %78 : vector<1x1x128xf32> to vector<8x16x128xf32>
        %80 = arith.mulf %75, %79 : vector<8x16x128xf32>
        %81 = arith.addf %72, %80 : vector<8x16x128xf32>
        %82 = arith.addi %8, %arg13 : i32
        %83 = arith.index_cast %82 : i32 to index
        %c10 = arith.constant 10 : index
        %c0_32 = arith.constant 0 : index
        %84 = vector.load %arg11[%83, %c10, %c0_32] : memref<22x27x128xf32, #tpu.memory_space<vmem>>, vector<8x16x128xf32>
        %85 = vector.extract_strided_slice %36 {offsets = [5, 0], sizes = [1, 128], strides = [1, 1]} : vector<7x128xf32> to vector<1x128xf32>
        %86 = vector.shape_cast %85 : vector<1x128xf32> to vector<128xf32>
        %87 = vector.shape_cast %86 : vector<128xf32> to vector<1x1x128xf32>
        %88 = vector.broadcast %87 : vector<1x1x128xf32> to vector<8x16x128xf32>
        %89 = arith.mulf %84, %88 : vector<8x16x128xf32>
        %90 = arith.addf %81, %89 : vector<8x16x128xf32>
        %91 = arith.addi %8, %arg13 : i32
        %92 = arith.index_cast %91 : i32 to index
        %c11 = arith.constant 11 : index
        %c0_33 = arith.constant 0 : index
        %93 = vector.load %arg11[%92, %c11, %c0_33] : memref<22x27x128xf32, #tpu.memory_space<vmem>>, vector<8x16x128xf32>
        %94 = vector.extract_strided_slice %36 {offsets = [6, 0], sizes = [1, 128], strides = [1, 1]} : vector<7x128xf32> to vector<1x128xf32>
        %95 = vector.shape_cast %94 : vector<1x128xf32> to vector<128xf32>
        %96 = vector.shape_cast %95 : vector<128xf32> to vector<1x1x128xf32>
        %97 = vector.broadcast %96 : vector<1x1x128xf32> to vector<8x16x128xf32>
        %98 = arith.mulf %93, %97 : vector<8x16x128xf32>
        %99 = arith.addf %90, %98 : vector<8x16x128xf32>
        scf.yield %99 : vector<8x16x128xf32>
      }
      %c7_i32_11 = arith.constant 7 : i32
      %c0 = arith.constant 0 : index
      %c0_12 = arith.constant 0 : index
      %12 = vector.load %arg7[%c0, %c0_12] : memref<1x128xf32, #tpu.memory_space<vmem>>, vector<1x128xf32>
      %13 = vector.shape_cast %12 : vector<1x128xf32> to vector<1x1x128xf32>
      %14 = vector.broadcast %13 : vector<1x1x128xf32> to vector<8x16x128xf32>
      %15 = arith.addf %11, %14 : vector<8x16x128xf32>
      %cst_13 = arith.constant 0.000000e+00 : f32
      %16 = vector.broadcast %cst_13 : f32 to vector<8x16x128xf32>
      %17 = arith.maximumf %15, %16 : vector<8x16x128xf32>
      %18 = vector.shape_cast %17 : vector<8x16x128xf32> to vector<128x128xf32>
      %19 = arith.truncf %18 : vector<128x128xf32> to vector<128x128xbf16>
      %c0_14 = arith.constant 0 : index
      %c0_15 = arith.constant 0 : index
      %20 = vector.load %arg8[%c0_14, %c0_15] : memref<128x128xbf16, #tpu.memory_space<vmem>>, vector<128x128xbf16>
      %cst_16 = arith.constant dense<0.000000e+00> : vector<128x128xf32>
      %21 = tpu.matmul %19, %20, %cst_16 {dimension_numbers = #tpu.dot_dimension_numbers<[1], [0], [0], [1], [0, 0, 1, 1], [], []>} : vector<128x128xbf16>, vector<128x128xbf16>, vector<128x128xf32> -> vector<128x128xf32>
      %c0_17 = arith.constant 0 : index
      %c0_18 = arith.constant 0 : index
      %22 = vector.load %arg9[%c0_17, %c0_18] : memref<1x128xf32, #tpu.memory_space<vmem>>, vector<1x128xf32>
      %23 = vector.broadcast %22 : vector<1x128xf32> to vector<128x128xf32>
      %24 = arith.addf %21, %23 : vector<128x128xf32>
      %c0_19 = arith.constant 0 : index
      %25 = arith.index_cast %8 : i32 to index
      %c0_20 = arith.constant 0 : index
      %c0_21 = arith.constant 0 : index
      %26 = vector.load %arg1[%c0_19, %25, %c0_20, %c0_21] : memref<1x16x16x128xf32, #tpu.memory_space<vmem>>, vector<1x8x16x128xf32>
      %27 = vector.shape_cast %26 : vector<1x8x16x128xf32> to vector<8x16x128xf32>
      %28 = vector.shape_cast %24 : vector<128x128xf32> to vector<8x16x128xf32>
      %29 = arith.addf %27, %28 : vector<8x16x128xf32>
      %c0_22 = arith.constant 0 : index
      %30 = arith.index_cast %8 : i32 to index
      %c0_23 = arith.constant 0 : index
      %c0_24 = arith.constant 0 : index
      %31 = vector.load %arg10[%c0_22, %30, %c0_23, %c0_24] : memref<1x16x16x128xf32, #tpu.memory_space<vmem>>, vector<1x8x16x128xf32>
      %32 = vector.shape_cast %31 : vector<1x8x16x128xf32> to vector<8x16x128xf32>
      %33 = vector.shape_cast %29 : vector<8x16x128xf32> to vector<1x8x16x128xf32>
      tpu.vector_store %arg10[%c0_22, %30, %c0_23, %c0_24], %33 {strides = array<i32>} : memref<1x16x16x128xf32, #tpu.memory_space<vmem>>, vector<1x8x16x128xf32>,
    }
    %c2_i32_6 = arith.constant 2 : i32
    return
  }
  func.func @transform_0(%arg0: i32) -> (i32, i32, i32, i32) {
    %c0_i32 = arith.constant 0 : i32
    %c0_i32_0 = arith.constant 0 : i32
    %c0_i32_1 = arith.constant 0 : i32
    %c0_i32_2 = arith.constant 0 : i32
    return %arg0, %c0_i32, %c0_i32_0, %c0_i32_1 : i32, i32, i32, i32
  }
  func.func @transform_1(%arg0: i32) -> (i32, i32) {
    %c0_i32 = arith.constant 0 : i32
    %c0_i32_0 = arith.constant 0 : i32
    %c0_i32_1 = arith.constant 0 : i32
    return %c0_i32, %c0_i32_0 : i32, i32
  }
  func.func @transform_2(%arg0: i32) -> (i32, i32) {
    %c0_i32 = arith.constant 0 : i32
    %c0_i32_0 = arith.constant 0 : i32
    %c0_i32_1 = arith.constant 0 : i32
    return %c0_i32, %c0_i32_0 : i32, i32
  }
  func.func @transform_3(%arg0: i32) -> (i32, i32) {
    %c0_i32 = arith.constant 0 : i32
    %c0_i32_0 = arith.constant 0 : i32
    %c0_i32_1 = arith.constant 0 : i32
    return %c0_i32, %c0_i32_0 : i32, i32
  }
  func.func @transform_4(%arg0: i32) -> (i32, i32) {
    %c0_i32 = arith.constant 0 : i32
    %c0_i32_0 = arith.constant 0 : i32
    %c0_i32_1 = arith.constant 0 : i32
    return %c0_i32, %c0_i32_0 : i32, i32
  }
  func.func @transform_5(%arg0: i32) -> (i32, i32) {
    %c0_i32 = arith.constant 0 : i32
    %c0_i32_0 = arith.constant 0 : i32
    %c0_i32_1 = arith.constant 0 : i32
    return %c0_i32, %c0_i32_0 : i32, i32
  }
  func.func @transform_6(%arg0: i32) -> (i32, i32) {
    %c0_i32 = arith.constant 0 : i32
    %c0_i32_0 = arith.constant 0 : i32
    %c0_i32_1 = arith.constant 0 : i32
    return %c0_i32, %c0_i32_0 : i32, i32
  }
  func.func @transform_7(%arg0: i32) -> (i32, i32) {
    %c0_i32 = arith.constant 0 : i32
    %c0_i32_0 = arith.constant 0 : i32
    %c0_i32_1 = arith.constant 0 : i32
    return %c0_i32, %c0_i32_0 : i32, i32
  }
  func.func @transform_8(%arg0: i32) -> (i32, i32) {
    %c0_i32 = arith.constant 0 : i32
    %c0_i32_0 = arith.constant 0 : i32
    %c0_i32_1 = arith.constant 0 : i32
    return %c0_i32, %c0_i32_0 : i32, i32
  }
  func.func @transform_9(%arg0: i32) -> (i32, i32, i32, i32) {
    %c0_i32 = arith.constant 0 : i32
    %c0_i32_0 = arith.constant 0 : i32
    %c0_i32_1 = arith.constant 0 : i32
    %c0_i32_2 = arith.constant 0 : i32
    return %arg0, %c0_i32, %c0_i32_0, %c0_i32_1 : i32, i32, i32, i32
  }
}

</mosaic_0001>

<bundles_post_ra>
// kernel: tpu_custom_call.1
= control target key start
LH: loop header
LB: loop body
LE: loop exit
PB: predicated region body
PF: predicated region fallthrough
CT: control target
= control target key end

     0   :  { %s3311_s0 = inlined_call_operand.hbm [shape: f32[2,16,16,128], index: 0, kind: input, shape index: {}]   ;;  %s3312_s1 = inlined_call_operand.vmem [shape: f32[1,128], index: 1, kind: input, shape index: {}]   ;;  %s3313_s2 = inlined_call_operand.vmem [shape: f32[1,128], index: 2, kind: input, shape index: {}]   ;;  %s3314_s3 = inlined_call_operand.hbm [shape: bf16[128,128], index: 3, kind: input, shape index: {}]   ;;  %s3315_s4 = inlined_call_operand.vmem [shape: f32[1,128], index: 4, kind: input, shape index: {}]   ;;  %s3316_s5 = inlined_call_operand.hbm [shape: f32[49,128], index: 5, kind: input, shape index: {}]   ;;  %s3317_s6 = inlined_call_operand.vmem [shape: f32[1,128], index: 6, kind: input, shape index: {}]   ;;  %s3318_s7 = inlined_call_operand.hbm [shape: bf16[128,128], index: 7, kind: input, shape index: {}]   ;;  %s3319_s8 = inlined_call_operand.vmem [shape: f32[1,128], index: 8, kind: input, shape index: {}]   ;;  %s3320_s9 = inlined_call_operand.hbm [shape: f32[2,16,16,128], index: 9, kind: output, shape index: {}]  }
   0x1   :  { %3329 = sst [smem:[#allocation18_spill]] %s3314_s3 }
   0x2   :  { %3330 = sst [smem:[#allocation19_spill]] %s3320_s9 }
   0x3   :  { %14 = vsyncpa [#allocation4], 0 }
   0x4   :  { %16 = vsyncpa [#allocation4 + $0x1], 0 }
   0x5   :  { %17 = vsyncpa [#allocation7], 0 }
   0x6   :  { %18 = vsyncpa [#allocation10], 0 }
   0x7   :  { %19 = vsyncpa [#allocation5], 0 }
   0x8   :  { %21 = vsyncpa [#allocation5 + $0x1], 0  ;;  %s2465_s30 = smov 0   ;;  %s2467_s10 = smov 0  }
   0x9   :  { %s2469_s11 = smov 0   ;;  %s2471_s12 = smov 0  }
   0xa LB: > { %3331 = sst [smem:[#allocation16_spill]] %s2313_s30  ;;  %s2486_s13 = sadd.s32 4294967295, %s2325_s12   ;;  %s2325_s12 = sphi %s2471_s12, %s3387_s12   ;;  %s2321_s11 = sphi %s2469_s11, %s3386_s11   ;;  %s2317_s10 = sphi %s2467_s10, %s3385_s10   ;;  %s2313_s30 = sphi %s2465_s30, %s3384_s30  }
   0xb   : > { %s1611_s14 = sadd.s32 4294967294, %s2325_s12   ;;  %p47_p0 = scmp.ne.s32.totalorder %s2317_s10, %s2313_s30 }
   0xc   : > { %p3321_p1 = scmp.eq.s32.totalorder %s2486_s13, 0  ;;  %p245_p3 = scmp.eq.s32.totalorder %s1611_s14, 1 }
   0xd   : > { %p1612_p5 = scmp.ge.s32.totalorder %s2325_s12, 1  ;;  %p252_p7 = scmp.lt.s32.totalorder %s2325_s12, 3 }
   0xe   : > { %p2495_p4 = por %p3321_p1, %p47_p0  ;;  %p2500_p6 = por %p245_p3, %p47_p0 }
   0xf   : > { %p2506_p9 = pnand %p1612_p5, %p252_p7  ;;  %s2403_s18 = smov [#allocation6]  }
  0x10   : > { %s3332_s15 = scalar_select %p2495_p4, 1, 0 }
  0x11   : > { %s3333_s16 = scalar_select %p2500_p6, 1, 0 }
  0x12   : > { %s3335_s17 = scalar_select %p2506_p9, 1, 0 }
  0x13   : > { %3334 = sst [smem:[#allocation17_spill]] %s3333_s16  ;;  %s270_s19 = sshll.u32 %s2403_s18, 4  ;;  %s2510_s19 = int_to_ptr.vmem [resolvable:$true] %s270_s19 }
  0x14   : > { %p1825_p10 = pneg %p2506_p9  ;;  %s2404_s21 = smov [#allocation8]  }
  0x15   : > { %s286_s22 = sshll.u32 %s2404_s21, 4  ;;  %s3337_s3 = sld [smem:[#allocation18_spill]]  ;;  %s2521_s22 = int_to_ptr.vmem [resolvable:$true] %s286_s22 }
  0x16   : > { %p2517_p12 = pnand %p1825_p10, %p3321_p1 }
  0x18   : > { %p2531_p0 = pneg %p2517_p12 }
  0x1b   : > { %s2061_s25 = scalar_lea.hbm %s3337_s3, 1024 }
  0x1c   : > { %p2062_p13 = scmp.ne.s32.totalorder %s3337_s3, %s2061_s25  ;;  %p2068_p7 = scmp.lt.u32.totalorder %s2061_s25, %s3337_s3 }
  0x1e   : > { %p2064_p3 = pnand %p2531_p0, %p2062_p13 }
  0x20   : > { %p2065_p5 = pneg %p2064_p3 }
  0x22   : > { %p2070_p10 = pnand %p2068_p7, %p2065_p5 }
  0x24   : > { %2073 = shalt.err (!%p2070_p10)
}
  0x25   : > { %s2074_s18 = scalar_lea.vmem %s2510_s19, 1024  ;;  %p2082_p2 = scmp.lt.s32.totalorder %s2510_s19, %s2510_s19 }
  0x26   : > { %p2075_p11 = scmp.ne.s32.totalorder %s2510_s19, %s2074_s18  ;;  %p2083_p6 = scmp.lt.s32.totalorder %s2074_s18, %s2074_s18 }
  0x28   : > { %p2077_p8 = pnand %p2075_p11, %p2531_p0  ;;  %p2084_p13 = por %p2083_p6, %p2082_p2 }
  0x2a   : > { %p2078_p1 = pneg %p2077_p8 }
  0x2c   : > { %p2085_p3 = pnand %p2084_p13, %p2078_p1 }
  0x2e   : > { %2088 = shalt.err (!%p2085_p3)
}
  0x2f   : > { %s3324_s21 = smov 64   ;;  %s3325_s23 = smov 4  }
  0x30   : > { %1828 = dma.hbm_to_vmem [thread:$0]  (!%p2517_p12), %s3337_s3, 1024, %s2510_s19, [#allocation7], %s3324_s21, %s3324_s21, %s3325_s23  }
  0x31   : > { %s2089_s29 = scalar_lea.hbm %s3316_s5, 896 }
  0x32   : > { %p2090_p1 = scmp.ne.s32.totalorder %s3316_s5, %s2089_s29  ;;  %p2096_p8 = scmp.lt.u32.totalorder %s2089_s29, %s3316_s5 }
  0x34   : > { %p2092_p2 = pnand %p2090_p1, %p2531_p0 }
  0x36   : > { %p2093_p6 = pneg %p2092_p2 }
  0x38   : > { %p2098_p11 = pnand %p2096_p8, %p2093_p6 }
  0x3a   : > { %2101 = shalt.err (!%p2098_p11)
}
  0x3b   : > { %s2102_s19 = scalar_lea.vmem %s2521_s22, 896  ;;  %p2110_p13 = scmp.lt.s32.totalorder %s2521_s22, %s2521_s22 }
  0x3c   : > { %p2103_p5 = scmp.ne.s32.totalorder %s2521_s22, %s2102_s19  ;;  %p2111_p3 = scmp.lt.s32.totalorder %s2102_s19, %s2102_s19 }
  0x3e   : > { %p2105_p7 = pnand %p2103_p5, %p2531_p0  ;;  %p2112_p1 = por %p2111_p3, %p2110_p13 }
  0x40   : > { %p2106_p10 = pneg %p2105_p7 }
  0x42   : > { %p2113_p2 = pnand %p2112_p1, %p2106_p10 }
  0x44   : > { %2116 = shalt.err (!%p2113_p2)
}
  0x45   : > { %s2407_s24 = smov 128   ;;  %s2408_s30 = smov 8  }
  0x46   : > { %1831 = dma.hbm_to_vmem [thread:$0]  (!%p2517_p12), %s3316_s5, 896, %s2521_s22, [#allocation7], %s2407_s24, %s2407_s24, %s2408_s30  }
  0x47   : > { %s2409_s26 = smov [#allocation9]   ;;  %s2582_s29 = sadd.s32 1, %s2325_s12  }
  0x48   : > { %s302_s27 = sshll.u32 %s2409_s26, 4  ;;  %s2117_s19 = scalar_lea.hbm %s3318_s7, 1024  ;;  %s303_s27 = int_to_ptr.vmem [resolvable:$true] %s302_s27 }
  0x49   : > { %p2118_p6 = scmp.ne.s32.totalorder %s3318_s7, %s2117_s19  ;;  %p2124_p5 = scmp.lt.u32.totalorder %s2117_s19, %s3318_s7 }
  0x4b   : > { %p2120_p8 = pnand %p2118_p6, %p2531_p0 }
  0x4d   : > { %p2121_p11 = pneg %p2120_p8 }
  0x4f   : > { %p2126_p7 = pnand %p2124_p5, %p2121_p11 }
  0x51   : > { %2129 = shalt.err (!%p2126_p7)
}
  0x52   : > { %s2130_s22 = scalar_lea.vmem %s303_s27, 1024  ;;  %p2138_p1 = scmp.lt.s32.totalorder %s303_s27, %s303_s27 }
  0x53   : > { %p2131_p10 = scmp.ne.s32.totalorder %s303_s27, %s2130_s22  ;;  %p2139_p2 = scmp.lt.s32.totalorder %s2130_s22, %s2130_s22 }
  0x55   : > { %p2133_p13 = pnand %p2131_p10, %p2531_p0  ;;  %p2140_p4 = por %p2139_p2, %p2138_p1 }
  0x57   : > { %p2134_p3 = pneg %p2133_p13 }
  0x59   : > { %p2141_p9 = pnand %p2140_p4, %p2134_p3 }
  0x5b   : > { %2144 = shalt.err (!%p2141_p9)
}
  0x5c   : > { %s3339_s21 = smov 4   ;;  %s3340_s23 = smov 64  }
  0x5d   : > { %1834 = dma.hbm_to_vmem [thread:$0]  (!%p2517_p12), %s3318_s7, 1024, %s303_s27, [#allocation10], %s3340_s23, %s3340_s23, %s3339_s21  }
  0x5e   : > { %s31_s28 = ssub.s32 %s2325_s12, %s2582_s29  ;;  %s34_s20 = sadd.s32 1, %s2321_s11 }
  0x5f   : > { %p32_p4 = scmp.eq.s32.totalorder %s31_s28, 0  ;;  %p41_p9 = scmp.ne.s32.totalorder %s2321_s11, %s2317_s10 }
  0x60   : > { %p42_p0 = scmp.eq.s32.totalorder %s2325_s12, 0  ;;  %p1846_p6 = scmp.lt.s32.totalorder %s2325_s12, 2 }
  0x61   : > { %s2613_s16 = scalar_select %p32_p4, %s2321_s11, %s34_s20  }
  0x62   : > { %p43_p8 = por %p42_p0, %p41_p9  ;;  %p3341_p11 = scmp.eq.s32.totalorder %s2486_s13, 1 }
  0x63   : > { %s319_s26 = sand.u32 1, %s2321_s11   ;;  %s1676_s14 = sshll.u32 %s2325_s12, 12 }
  0x64   : > { %p2617_p5 = por %p3341_p11, %p41_p9  ;;  %s1617_s18 = sshll.u32 %s319_s26, 8 }
  0x65   : > { %s2626_s27 = scalar_lea.hbm %s3311_s0, %s1676_s14  ;;  %s323_s21 = scalar_lea.vmem [#allocation3], %s1617_s18 }
  0x66   : > { %s330_s23 = sshll.u32 %s323_s21, 4  ;;  %p2628_p12 = pnand %p1846_p6, %p43_p8  ;;  %s2632_s23 = int_to_ptr.vmem [resolvable:$true] %s330_s23 }
  0x67   : > { %s2634_s9 = scalar_lea.sflag [#allocation4], %s319_s26  ;;  %s2145_s28 = scalar_lea.hbm %s2626_s27, 4096 }
  0x68   : > { %p2146_p7 = scmp.ne.s32.totalorder %s2626_s27, %s2145_s28  ;;  %p2147_p10 = pneg %p2628_p12 }
  0x69   : > { %s2150_s18 = scalar_lea.hbm %s3311_s0, 8192  ;;  %p2151_p1 = scmp.lt.u32.totalorder %s2626_s27, %s3311_s0 }
  0x6a   : > { %p2148_p13 = pnand %p2147_p10, %p2146_p7  ;;  %p2152_p2 = scmp.lt.u32.totalorder %s2150_s18, %s2145_s28 }
  0x6b   : > { %p2154_p9 = scmp.lt.u32.totalorder %s2145_s28, %s2626_s27 }
  0x6c   : > { %p2149_p3 = pneg %p2148_p13  ;;  %p2153_p4 = por %p2152_p2, %p2151_p1 }
  0x6e   : > { %p2155_p0 = por %p2154_p9, %p2153_p4 }
  0x70   : > { %p2156_p6 = pnand %p2155_p0, %p2149_p3 }
  0x72   : > { %2159 = shalt.err (!%p2156_p6)
}
  0x73   : > { %s2160_s26 = scalar_lea.vmem %s2632_s23, 4096  ;;  %s2410_s21 = smov [#allocation3]  }
  0x74   : > { %p2161_p8 = scmp.ne.s32.totalorder %s2632_s23, %s2160_s26  ;;  %s2165_s20 = sshll.u32 %s2410_s21, 4  ;;  %s2166_s20 = int_to_ptr.vmem [resolvable:$false] %s2165_s20 }
  0x75   : > { %s2167_s14 = scalar_lea.vmem %s2166_s20, 8192  ;;  %p2168_p13 = scmp.lt.s32.totalorder %s2632_s23, %s2166_s20 }
  0x76   : > { %p2163_p11 = pnand %p2161_p8, %p2147_p10  ;;  %p2169_p1 = scmp.lt.s32.totalorder %s2167_s14, %s2160_s26 }
  0x78   : > { %p2164_p7 = pneg %p2163_p11  ;;  %p2170_p2 = por %p2169_p1, %p2168_p13 }
  0x7a   : > { %p2171_p4 = pnand %p2170_p2, %p2164_p7 }
  0x7c   : > { %2174 = shalt.err (!%p2171_p4)
}
  0x7d   : > { %1838 = dma.hbm_to_vmem [thread:$0]  (!%p2628_p12), %s2626_s27, 4096, %s2632_s23, %s2634_s9, %s2407_s24, %s2407_s24, %s2408_s30  }
  0x7e   : > { %p3344_p10 = scmp.ne.s32.totalorder %s3335_s17, 0 }
  0x7f   : > { %s2668_s28 = sand.u32 (!%p3344_p10), 1, %s2317_s10   ;;  %p3345_p3 = scmp.ne.s32.totalorder (!%p3344_p10), %s3332_s15, 0 }
  0x80   : > { %342 = sbr.rel (%p3344_p10) target bundleno = 779 (0x30b), region = 56  ;;  %s1621_s18 = sshll.u32 (!%p3344_p10), %s2668_s28, 8 }
  0x81   : > { %s345_s19 = scalar_lea.sflag (!%p3344_p10), [#allocation4], %s2668_s28  ;;  %s2672_s22 = scalar_lea.vmem (!%p3344_p10), [#allocation3], %s1621_s18 }
  0x87   : > { %2296 = dma.done.wait (%p3345_p3), %s345_s19, 4096  }
  0x88   : > { %2298 = vsyncadd (%p3345_p3), %s345_s19, 4294963200  ;;  %p3346_p12 = scmp.eq.s32.totalorder %s2486_s13, 0 }
  0x8a   : > { %2300 = dma.done.wait (%p3346_p12), [#allocation7], 1920   ;;  %p3347_p9 = pmov %p3346_p12 }
  0x8c   : > { %2302 = vsyncadd (%p3347_p9), [#allocation7], 4294965376  ;;  %p3348_p0 = pmov %p3347_p9 }
  0x8e   : > { %2304 = dma.done.wait (%p3348_p0), [#allocation10], 1024   ;;  %p3349_p6 = pmov %p3348_p0 }
  0x8f   : > { %s2686_s17 = scalar_lea.vmem [#allocation11], %s1621_s18  ;;  %p3350_p8 = scmp.ne.s32.totalorder %s2486_s13, 0 }
  0x90   : > { %2306 = vsyncadd (%p3349_p6), [#allocation10], 4294966272  ;;  %v2411_v0 = vmov (!%p3350_p8), 0.0  }
  0x91   : > { %399 = sbr.rel (%p3350_p8) target bundleno = 176 (0xb0), region = 76  ;;  %401 = vst [vmem:[#allocation2 + $0x8] sm:$0xff] (!%p3350_p8), %v2411_v0  ;;  %402 = vst [vmem:[#allocation2 + $0x10] sm:$0xff] (!%p3350_p8), %v2411_v0 }
  0x92   : > { %403 = vst [vmem:[#allocation2 + $0x18] sm:$0x7] (!%p3350_p8), %v2411_v0  ;;  %405 = vst [vmem:[#allocation2 + $0x28] sm:$0xff] (!%p3350_p8), %v2411_v0 }
  0x93   : > { %406 = vst [vmem:[#allocation2 + $0x30] sm:$0xff] (!%p3350_p8), %v2411_v0  ;;  %407 = vst [vmem:[#allocation2 + $0x38] sm:$0x7] (!%p3350_p8), %v2411_v0 }
  0x94   : > { %409 = vst [vmem:[#allocation2 + $0x48] sm:$0xff] (!%p3350_p8), %v2411_v0  ;;  %410 = vst [vmem:[#allocation2 + $0x50] sm:$0xff] (!%p3350_p8), %v2411_v0 }
  0x95   : > { %411 = vst [vmem:[#allocation2 + $0x58] sm:$0x7] (!%p3350_p8), %v2411_v0  ;;  %414 = vst [vmem:[#allocation2 + $0x268] sm:$0xff] (!%p3350_p8), %v2411_v0 }
  0x96   : > { %415 = vst [vmem:[#allocation2 + $0x270] sm:$0xff] (!%p3350_p8), %v2411_v0  ;;  %416 = vst [vmem:[#allocation2 + $0x278] sm:$0x7] (!%p3350_p8), %v2411_v0 }
  0x97   : > { %418 = vst [vmem:[#allocation2 + $0x288] sm:$0xff] (!%p3350_p8), %v2411_v0  ;;  %419 = vst [vmem:[#allocation2 + $0x290] sm:$0xff] (!%p3350_p8), %v2411_v0 }
  0x98   : > { %420 = vst [vmem:[#allocation2 + $0x298] sm:$0x7] %v2411_v0  ;;  %422 = vst [vmem:[#allocation2 + $0x2a8] sm:$0xff] %v2411_v0 }
  0x99   : > { %423 = vst [vmem:[#allocation2 + $0x2b0] sm:$0xff] %v2411_v0  ;;  %424 = vst [vmem:[#allocation2 + $0x2b8] sm:$0x7] %v2411_v0 }
  0x9a   : > { %428 = vst [vmem:[#allocation2 + $0x78] sm:$0x7] %v2411_v0  ;;  %429 = vst [vmem:[#allocation2 + $0x98] sm:$0x7] %v2411_v0 }
  0x9b   : > { %430 = vst [vmem:[#allocation2 + $0xb8] sm:$0x7] %v2411_v0  ;;  %431 = vst [vmem:[#allocation2 + $0xd8] sm:$0x7] %v2411_v0 }
  0x9c   : > { %432 = vst [vmem:[#allocation2 + $0xf8] sm:$0x7] %v2411_v0  ;;  %433 = vst [vmem:[#allocation2 + $0x118] sm:$0x7] %v2411_v0 }
  0x9d   : > { %434 = vst [vmem:[#allocation2 + $0x138] sm:$0x7] %v2411_v0  ;;  %435 = vst [vmem:[#allocation2 + $0x158] sm:$0x7] %v2411_v0 }
  0x9e   : > { %436 = vst [vmem:[#allocation2 + $0x178] sm:$0x7] %v2411_v0  ;;  %437 = vst [vmem:[#allocation2 + $0x198] sm:$0x7] %v2411_v0 }
  0x9f   : > { %438 = vst [vmem:[#allocation2 + $0x1b8] sm:$0x7] %v2411_v0  ;;  %439 = vst [vmem:[#allocation2 + $0x1d8] sm:$0x7] %v2411_v0 }
  0xa0   : > { %440 = vst [vmem:[#allocation2 + $0x1f8] sm:$0x7] %v2411_v0  ;;  %441 = vst [vmem:[#allocation2 + $0x218] sm:$0x7] %v2411_v0 }
  0xa1   : > { %442 = vst [vmem:[#allocation2 + $0x238] sm:$0x7] %v2411_v0  ;;  %443 = vst [vmem:[#allocation2 + $0x258] sm:$0x7] %v2411_v0 }
  0xa2   : > { %447 = vst [vmem:[#allocation2] sm:$0xff] %v2411_v0  ;;  %450 = vst [vmem:[#allocation2 + $0x60] sm:$0xff] %v2411_v0 }
  0xa3   : > { %451 = vst [vmem:[#allocation2 + $0x80] sm:$0xff] %v2411_v0  ;;  %452 = vst [vmem:[#allocation2 + $0xa0] sm:$0xff] %v2411_v0 }
  0xa4   : > { %453 = vst [vmem:[#allocation2 + $0xc0] sm:$0xff] %v2411_v0  ;;  %454 = vst [vmem:[#allocation2 + $0xe0] sm:$0xff] %v2411_v0 }
  0xa5   : > { %455 = vst [vmem:[#allocation2 + $0x100] sm:$0xff] %v2411_v0  ;;  %456 = vst [vmem:[#allocation2 + $0x120] sm:$0xff] %v2411_v0 }
  0xa6   : > { %457 = vst [vmem:[#allocation2 + $0x140] sm:$0xff] %v2411_v0  ;;  %458 = vst [vmem:[#allocation2 + $0x160] sm:$0xff] %v2411_v0 }
  0xa7   : > { %459 = vst [vmem:[#allocation2 + $0x180] sm:$0xff] %v2411_v0  ;;  %460 = vst [vmem:[#allocation2 + $0x1a0] sm:$0xff] %v2411_v0 }
  0xa8   : > { %461 = vst [vmem:[#allocation2 + $0x1c0] sm:$0xff] %v2411_v0  ;;  %462 = vst [vmem:[#allocation2 + $0x1e0] sm:$0xff] %v2411_v0 }
  0xa9   : > { %463 = vst [vmem:[#allocation2 + $0x200] sm:$0xff] %v2411_v0  ;;  %464 = vst [vmem:[#allocation2 + $0x220] sm:$0xff] %v2411_v0 }
  0xaa   : > { %465 = vst [vmem:[#allocation2 + $0x240] sm:$0xff] %v2411_v0  ;;  %448 = vst [vmem:[#allocation2 + $0x20] sm:$0xff] %v2411_v0 }
  0xab   : > { %449 = vst [vmem:[#allocation2 + $0x40] sm:$0xff] %v2411_v0  ;;  %466 = vst [vmem:[#allocation2 + $0x260] sm:$0xff] %v2411_v0 }
  0xac   : > { %467 = vst [vmem:[#allocation2 + $0x280] sm:$0xff] %v2411_v0  ;;  %468 = vst [vmem:[#allocation2 + $0x2a0] sm:$0xff] %v2411_v0 }
  0xad   : > { %425 = vst [vmem:[#allocation2 + $0x18] sm:$0x7] %v2411_v0  ;;  %426 = vst [vmem:[#allocation2 + $0x38] sm:$0x7] %v2411_v0 }
  0xae   : > { %427 = vst [vmem:[#allocation2 + $0x58] sm:$0x7] %v2411_v0  ;;  %444 = vst [vmem:[#allocation2 + $0x278] sm:$0x7] %v2411_v0 }
  0xaf   : > { %445 = vst [vmem:[#allocation2 + $0x298] sm:$0x7] %v2411_v0  ;;  %446 = vst [vmem:[#allocation2 + $0x2b8] sm:$0x7] %v2411_v0 }
  0xb0 PF: > { %s2690_s15 = smov 0  }
  0xb1 LB: >> { %v2045_v1 = vld [vmem:[#allocation6] sm:$0xff]   ;;  %v2046_v2 = vld [vmem:[#allocation6 + $0x8] sm:$0xff]   ;;  %s1677_s24 = sshll.u32 %s2329_s15, 7  ;;  %v2047_v3 = vld [vmem:[#allocation6 + $0x10] sm:$0xff]   ;;  %s1678_s20 = sshll.u32 %s2329_s15, 8  ;;  %s2329_s15 = sphi %s2690_s15, %s474_s15  }
  0xb2   : >> { %1713 = vmatprep.subr.bf16.mxu0 %v2045_v1  ;;  %1777 = vmatprep.subr.bf16.mxu1 %v2045_v1  ;;  %s2697_s30 = scalar_lea.vmem %s2672_s22, %s1677_s24 [#allocation3]  ;;  %v2048_v4 = vld [vmem:[#allocation6 + $0x18] sm:$0xff]   ;;  %v2704_v7 = vld [vmem:[%s3312_s1] ss:$0 sm:$0xff]  ;;  %v2050_v22 = vld [vmem:[#allocation6 + $0x28] sm:$0xff]   ;;  %s2761_s14 = scalar_lea.vmem [#allocation2], %s1678_s20 }
  0xb3   : >> { %1714 = vmatpush3.bf16.msra.mxu0 %v2045_v1  ;;  %1785 = vmatpush3.bf16.msra.mxu1 %v2045_v1  ;;  %v478_v5 = vld [vmem:[%s2697_s30] sm:$0xff]  ;;  %v479_v6 = vld [vmem:[%s2697_s30 + $0x8] sm:$0xff]  ;;  %v2051_v23 = vld [vmem:[#allocation6 + $0x30] sm:$0xff]   ;;  %s474_s15 = sadd.s32 1, %s2329_s15  }
  0xb4   : >> { %1715 = vmatprep.subr.bf16.mxu0 %v2046_v2  ;;  %1778 = vmatprep.subr.bf16.mxu1 %v2046_v2  ;;  %v501_v8 = vmul.f32 %v2704_v7, %v478_v5  ;;  %v502_v9 = vmul.f32 %v2704_v7, %v479_v6  ;;  %v2711_v10 = vld [vmem:[%s3313_s2] ss:$0 sm:$0xff]  ;;  %v487_v12 = vld [vmem:[%s2697_s30 + $0x48] sm:$0xff]  ;;  %v480_v24 = vld [vmem:[%s2697_s30 + $0x10] sm:$0xff]  ;;  %p471_p11 = scmp.ge.s32.totalorder %s474_s15, 2  }
  0xb5   : >> { %v486_v11 = vld [vmem:[%s2697_s30 + $0x40] sm:$0xff]  ;;  %v510_v14 = vmul.f32 %v2704_v7, %v487_v12  ;;  %v481_v25 = vld [vmem:[%s2697_s30 + $0x18] sm:$0xff]  ;;  %v488_v26 = vld [vmem:[%s2697_s30 + $0x50] sm:$0xff]  ;;  %v503_v32 = vmul.f32 %v2704_v7, %v480_v24  ;;  %s2782_s18 = smov (%p471_p11), 0  }
  0xb6   : >> { %v509_v13 = vmul.f32 %v2704_v7, %v486_v11  ;;  %v524_v15 = vadd.f32 %v2711_v10, %v501_v8  ;;  %v525_v16 = vadd.f32 %v2711_v10, %v502_v9  ;;  %v2049_v17 = vld [vmem:[#allocation6 + $0x20] sm:$0xff]   ;;  %v489_v27 = vld [vmem:[%s2697_s30 + $0x58] sm:$0xff]  ;;  %v483_v29 = vld [vmem:[%s2697_s30 + $0x28] sm:$0xff]  ;;  %v504_v33 = vmul.f32 %v2704_v7, %v481_v25 }
  0xb7   : >> { %1716 = vmatpush3.bf16.msra.mxu0 %v2046_v2  ;;  %1786 = vmatpush3.bf16.msra.mxu1 %v2046_v2  ;;  %v533_v19 = vadd.f32 %v2711_v10, %v510_v14  ;;  %v482_v28 = vld [vmem:[%s2697_s30 + $0x20] sm:$0xff]  ;;  %v491_v31 = vld [vmem:[%s2697_s30 + $0x68] sm:$0xff]  ;;  %v511_v34 = vmul.f32 %v2704_v7, %v488_v26  ;;  %v512_v35 = vmul.f32 %v2704_v7, %v489_v27  ;;  %v2052_v40 = vld [vmem:[#allocation6 + $0x38] sm:$0xff]  }
  0xb8   : >> { %1717 = vmatprep.subr.bf16.mxu0 %v2047_v3  ;;  %1779 = vmatprep.subr.bf16.mxu1 %v2047_v3  ;;  %v532_v18 = vadd.f32 %v2711_v10, %v509_v13  ;;  %v540_v20 = vpack.c.bf16 %v525_v16, %v524_v15  ;;  %v490_v30 = vld [vmem:[%s2697_s30 + $0x60] sm:$0xff]  ;;  %v505_v36 = vmul.f32 %v2704_v7, %v482_v28  ;;  %v484_v46 = vld [vmem:[%s2697_s30 + $0x30] sm:$0xff]  ;;  %v485_v50 = vld [vmem:[%s2697_s30 + $0x38] sm:$0xff] }
  0xb9   : >> { %v506_v37 = vmul.f32 %v2704_v7, %v483_v29  ;;  %v513_v38 = vmul.f32 %v2704_v7, %v490_v30  ;;  %v514_v39 = vmul.f32 %v2704_v7, %v491_v31  ;;  %v526_v41 = vadd.f32 %v2711_v10, %v503_v32  ;;  %v492_v51 = vld [vmem:[%s2697_s30 + $0x70] sm:$0xff]  ;;  %v493_v52 = vld [vmem:[%s2697_s30 + $0x78] sm:$0xff] }
  0xba   : >> { %v544_v21 = vpack.c.bf16 %v533_v19, %v532_v18  ;;  %1729 = vmatprep.mubr.bf16.mxu0 %v540_v20  ;;  %v527_v42 = vadd.f32 %v2711_v10, %v504_v33  ;;  %v534_v43 = vadd.f32 %v2711_v10, %v511_v34  ;;  %v535_v44 = vadd.f32 %v2711_v10, %v512_v35 }
  0xbb   : >> { %1718 = vmatpush3.bf16.msra.mxu0 %v2047_v3  ;;  %1787 = vmatpush3.bf16.msra.mxu1 %v2047_v3  ;;  %v528_v45 = vadd.f32 %v2711_v10, %v505_v36  ;;  %v529_v47 = vadd.f32 %v2711_v10, %v506_v37  ;;  %v536_v48 = vadd.f32 %v2711_v10, %v513_v38  ;;  %v1631_v3 = vld [vmem:[%s3315_s4] ss:$0 sm:$0xff] }
  0xbc   : >> { %1719 = vmatprep.subr.bf16.mxu0 %v2048_v4  ;;  %1780 = vmatprep.subr.bf16.mxu1 %v2048_v4  ;;  %v537_v49 = vadd.f32 %v2711_v10, %v514_v39  ;;  %v541_v53 = vpack.c.bf16 %v527_v42, %v526_v41  ;;  %v507_v54 = vmul.f32 %v2704_v7, %v484_v46 }
  0xbd   : >> { %1737 = vmatprep.mubr.bf16.mxu1 %v544_v21  ;;  %v545_v55 = vpack.c.bf16 %v535_v44, %v534_v43  ;;  %v508_v56 = vmul.f32 %v2704_v7, %v485_v50  ;;  %v515_v57 = vmul.f32 %v2704_v7, %v492_v51  ;;  %v516_v58 = vmul.f32 %v2704_v7, %v493_v52 }
  0xbe   : >> { %v542_v59 = vpack.c.bf16 %v529_v47, %v528_v45  ;;  %v546_v60 = vpack.c.bf16 %v537_v49, %v536_v48  ;;  %v530_v61 = vadd.f32 %v2711_v10, %v507_v54 }
  0xbf   : >> { %1720 = vmatpush3.bf16.msra.mxu0 %v2048_v4  ;;  %1788 = vmatpush3.bf16.msra.mxu1 %v2048_v4  ;;  %v531_v62 = vadd.f32 %v2711_v10, %v508_v56  ;;  %v538_v63 = vadd.f32 %v2711_v10, %v515_v57  ;;  %v539_v0 = vadd.f32 %v2711_v10, %v516_v58 }
  0xc0   : >> { %1721 = vmatprep.subr.bf16.mxu0 %v2049_v17  ;;  %1781 = vmatprep.subr.bf16.mxu1 %v2049_v17 }
  0xc1   : >> { %v543_v1 = vpack.c.bf16 %v531_v62, %v530_v61  ;;  %v547_v2 = vpack.c.bf16 %v539_v0, %v538_v63 }
  0xc3   : >> { %1722 = vmatpush3.bf16.msra.mxu0 %v2049_v17  ;;  %1789 = vmatpush3.bf16.msra.mxu1 %v2049_v17 }
  0xc4   : >> { %1723 = vmatprep.subr.bf16.mxu0 %v2050_v22  ;;  %1782 = vmatprep.subr.bf16.mxu1 %v2050_v22 }
  0xc7   : >> { %1724 = vmatpush3.bf16.msra.mxu0 %v2050_v22  ;;  %1790 = vmatpush3.bf16.msra.mxu1 %v2050_v22 }
  0xc8   : >> { %1725 = vmatprep.subr.bf16.mxu0 %v2051_v23  ;;  %1783 = vmatprep.subr.bf16.mxu1 %v2051_v23 }
  0xcb   : >> { %1726 = vmatpush3.bf16.msra.mxu0 %v2051_v23  ;;  %1791 = vmatpush3.bf16.msra.mxu1 %v2051_v23 }
  0xcc   : >> { %1727 = vmatprep.subr.bf16.mxu0 %v2052_v40  ;;  %1784 = vmatprep.subr.bf16.mxu1 %v2052_v40 }
  0xcf   : >> { %1728 = vmatpush3.bf16.msra.mxu0 %v2052_v40  ;;  %1792 = vmatpush3.bf16.msra.mxu1 %v2052_v40 }
  0xd2   : >> { %1730 = vmatmul.mubr.bf16.vlgmr.msra.gmra.mrb[0].mxu0 %v541_v53  ;;  %1738 = vmatmul.mubr.bf16.vlgmr.msra.gmra.mrb[0].mxu1 %v545_v55 }
  0xd3   : >> { %1733 = vmatprep.mubr.bf16.mxu0 %v542_v59  ;;  %1741 = vmatprep.mubr.bf16.mxu1 %v546_v60 }
  0xda   : >> { %1734 = vmatmul.mubr.bf16.gmra.mrb[4].mxu0 %v543_v1  ;;  %1742 = vmatmul.mubr.bf16.gmra.mrb[4].mxu1 %v547_v2 }
 0x1a5   : >> { %v1731_v4 = vpop.f32.mrb[0].mxu0  ;;  %v1739_v5 = vpop.f32.mrb[0].mxu1 }
 0x1a6   : >> { %v662_v6 = vadd.f32 %v1731_v4, %v1631_v3  ;;  %v694_v7 = vadd.f32 %v1739_v5, %v1631_v3  ;;  %v653_v8 = vpop.f32.mrb[1].mxu0  ;;  %v685_v9 = vpop.f32.mrb[1].mxu1 }
 0x1a7   : >> { %v654_v11 = vadd.f32 %v1631_v3, %v653_v8  ;;  %v686_v12 = vadd.f32 %v1631_v3, %v685_v9  ;;  %v1732_v10 = vpop.f32.mrb[2].mxu0  ;;  %v1740_v13 = vpop.f32.mrb[2].mxu1 }
 0x1a8   : >> { %v718_v14 = vmax.f32 %v662_v6, 0.0  ;;  %v726_v15 = vmax.f32 %v694_v7, 0.0  ;;  %v665_v16 = vadd.f32 %v1732_v10, %v1631_v3  ;;  %v697_v17 = vadd.f32 %v1740_v13, %v1631_v3  ;;  %v656_v18 = vpop.f32.mrb[3].mxu0  ;;  %v688_v19 = vpop.f32.mrb[3].mxu1 }
 0x1a9   : >> { %v716_v20 = vmax.f32 %v654_v11, 0.0  ;;  %v724_v21 = vmax.f32 %v686_v12, 0.0  ;;  %v657_v22 = vadd.f32 %v1631_v3, %v656_v18  ;;  %v689_v23 = vadd.f32 %v1631_v3, %v688_v19 }
 0x1aa   : >> { %1644 = vst [vmem:[%s2761_s14 + $0x88] sm:$0xff] %v718_v14  ;;  %1652 = vst [vmem:[%s2761_s14 + $0x108] sm:$0xff] %v726_v15  ;;  %v719_v24 = vmax.f32 %v665_v16, 0.0  ;;  %v727_v25 = vmax.f32 %v697_v17, 0.0 }
 0x1ab   : >> { %1642 = vst [vmem:[%s2761_s14 + $0x68] sm:$0xff] %v716_v20  ;;  %1650 = vst [vmem:[%s2761_s14 + $0xe8] sm:$0xff] %v724_v21  ;;  %v717_v26 = vmax.f32 %v657_v22, 0.0  ;;  %v725_v27 = vmax.f32 %v689_v23, 0.0 }
 0x1ac   : >> { %1645 = vst [vmem:[%s2761_s14 + $0x90] sm:$0xff] %v719_v24  ;;  %1653 = vst [vmem:[%s2761_s14 + $0x110] sm:$0xff] %v727_v25 }
 0x1ad   : >> { %1643 = vst [vmem:[%s2761_s14 + $0x70] sm:$0xff] %v717_v26  ;;  %1651 = vst [vmem:[%s2761_s14 + $0xf0] sm:$0xff] %v725_v27  ;;  %v1735_v28 = vpop.f32.mrb[4].mxu0  ;;  %v1743_v29 = vpop.f32.mrb[4].mxu1 }
 0x1ae   : >> { %v678_v30 = vadd.f32 %v1735_v28, %v1631_v3  ;;  %v710_v31 = vadd.f32 %v1743_v29, %v1631_v3  ;;  %v669_v32 = vpop.f32.mrb[5].mxu0  ;;  %v701_v33 = vpop.f32.mrb[5].mxu1 }
 0x1af   : >> { %v670_v34 = vadd.f32 %v1631_v3, %v669_v32  ;;  %v702_v35 = vadd.f32 %v1631_v3, %v701_v33  ;;  %v1736_v36 = vpop.f32.mrb[6].mxu0  ;;  %v1744_v37 = vpop.f32.mrb[6].mxu1  ;;  %473 = sbr.rel (!%p471_p11) target bundleno = 177 (0xb1), region = 145 }
 0x1b0   : >> { %v722_v38 = vmax.f32 %v678_v30, 0.0  ;;  %v730_v39 = vmax.f32 %v710_v31, 0.0  ;;  %v681_v40 = vadd.f32 %v1736_v36, %v1631_v3  ;;  %v713_v41 = vadd.f32 %v1744_v37, %v1631_v3  ;;  %v672_v42 = vpop.f32.mrb[7].mxu0  ;;  %v704_v43 = vpop.f32.mrb[7].mxu1 }
 0x1b1   : >> { %v720_v44 = vmax.f32 %v670_v34, 0.0  ;;  %v728_v45 = vmax.f32 %v702_v35, 0.0  ;;  %v673_v46 = vadd.f32 %v1631_v3, %v672_v42  ;;  %v705_v47 = vadd.f32 %v1631_v3, %v704_v43 }
 0x1b2   : >> { %1648 = vst [vmem:[%s2761_s14 + $0xc8] sm:$0xff] %v722_v38  ;;  %1656 = vst [vmem:[%s2761_s14 + $0x148] sm:$0xff] %v730_v39  ;;  %v723_v48 = vmax.f32 %v681_v40, 0.0  ;;  %v731_v49 = vmax.f32 %v713_v41, 0.0 }
 0x1b3   : >> { %1646 = vst [vmem:[%s2761_s14 + $0xa8] sm:$0xff] %v720_v44  ;;  %1654 = vst [vmem:[%s2761_s14 + $0x128] sm:$0xff] %v728_v45  ;;  %v721_v50 = vmax.f32 %v673_v46, 0.0  ;;  %v729_v51 = vmax.f32 %v705_v47, 0.0 }
 0x1b4   : >> { %1649 = vst [vmem:[%s2761_s14 + $0xd0] sm:$0xff] %v723_v48  ;;  %1657 = vst [vmem:[%s2761_s14 + $0x150] sm:$0xff] %v731_v49 }
 0x1b5   : >> { %1647 = vst [vmem:[%s2761_s14 + $0xb0] sm:$0xff] %v721_v50  ;;  %1655 = vst [vmem:[%s2761_s14 + $0x130] sm:$0xff] %v729_v51 }
 0x1b6 LB: >> { %s1658_s19 = sshll.u32 %s2333_s18, 3  ;;  %v2788_v52 = vmov 0.0   ;;  %v2790_v53 = vmov 0.0   ;;  %v2792_v54 = vmov 0.0   ;;  %v2794_v55 = vmov 0.0   ;;  %s2820_s15 = smov 0   ;;  %s2333_s18 = sphi %s2782_s18, %s756_s18  }
 0x1b7   : >> { %v2796_v56 = vmov 0.0   ;;  %v2798_v57 = vmov 0.0   ;;  %v2800_v58 = vmov 0.0   ;;  %v2802_v59 = vmov 0.0  }
 0x1b8   : >> { %v2804_v60 = vmov 0.0   ;;  %v2806_v61 = vmov 0.0   ;;  %v2808_v62 = vmov 0.0   ;;  %v2810_v63 = vmov 0.0  }
 0x1b9   : >> { %v2812_v0 = vmov 0.0   ;;  %v2814_v1 = vmov 0.0   ;;  %v2816_v2 = vmov 0.0   ;;  %v2818_v3 = vmov 0.0  }
 0x1ba LB: >>> { %s780_s24 = smul.u32 7, %s2401_s15  ;;  %s783_s30 = sadd.s32 %s2401_s15, %s1658_s19  ;;  %v802_v4 = vlaneseq  ;;  %s2401_s15 = sphi %s2820_s15, %s763_s15   ;;  %v2397_v3 = vphi %v2818_v3, %v3378_v3   ;;  %v2393_v2 = vphi %v2816_v2, %v3377_v2   ;;  %v2389_v1 = vphi %v2814_v1, %v3376_v1   ;;  %v2385_v0 = vphi %v2812_v0, %v3375_v0   ;;  %v2381_v63 = vphi %v2810_v63, %v3374_v63   ;;  %v2377_v62 = vphi %v2808_v62, %v3373_v62   ;;  %v2373_v61 = vphi %v2806_v61, %v3372_v61   ;;  %v2369_v60 = vphi %v2804_v60, %v3371_v60   ;;  %v2365_v59 = vphi %v2802_v59, %v3370_v59   ;;  %v2361_v58 = vphi %v2800_v58, %v3369_v58   ;;  %v2357_v57 = vphi %v2798_v57, %v3368_v57   ;;  %v2353_v56 = vphi %v2796_v56, %v3367_v56   ;;  %v2349_v55 = vphi %v2794_v55, %v3366_v55   ;;  %v2345_v54 = vphi %v2792_v54, %v3365_v54   ;;  %v2341_v53 = vphi %v2790_v53, %v3364_v53   ;;  %v2337_v52 = vphi %v2788_v52, %v3363_v52  }
 0x1bb   : >>> { %s1659_s27 = sshll.u32 %s783_s30, 5  ;;  %s763_s15 = sadd.s32 1, %s2401_s15  }
 0x1bc   : >>> { %v2869_v5 = vshrl.u32 %v802_v4, 7  ;;  %s781_s23 = scalar_lea.vmem [#allocation8], %s780_s24  ;;  %s2876_s3 = scalar_lea.vmem [#allocation2], %s1659_s27 }
 0x1bd   : >>> { %v2871_v6 = vld [vmem:[%s781_s23] sm:$0x7f]  ;;  %v787_v14 = vld [vmem:[%s2876_s3 + $0xd] sm:$0xff]  ;;  %p3130_p7 = scmp.ge.s32.totalorder %s763_s15, 7  }
 0x1be   : >>> { %v804_v7 = vsub.s32 0, %v2869_v5  ;;  %v856_v8 = vsub.s32 1, %v2869_v5  ;;  %v908_v9 = vsub.s32 2, %v2869_v5  ;;  %v786_v11 = vld [vmem:[%s2876_s3 + $0x5] sm:$0xff]  ;;  %v960_v12 = vsub.s32 3, %v2869_v5  ;;  %v789_v16 = vld [vmem:[%s2876_s3 + $0x2d] sm:$0xff] }
 0x1bf   : >>> { %v1012_v10 = vsub.s32 4, %v2869_v5  ;;  %v1064_v13 = vsub.s32 5, %v2869_v5  ;;  %v788_v15 = vld [vmem:[%s2876_s3 + $0x25] sm:$0xff]  ;;  %v791_v19 = vld [vmem:[%s2876_s3 + $0x4d] sm:$0xff]  ;;  %v1116_v26 = vsub.s32 6, %v2869_v5  ;;  %s1679_s20 = sshll.u32 (%p3130_p7), %s2333_s18, 7 }
 0x1c0   : >>> { %v805_v17 = vrot.slane %v2871_v6, %v804_v7  ;;  %v790_v18 = vld [vmem:[%s2876_s3 + $0x45] sm:$0xff]  ;;  %v793_v21 = vld [vmem:[%s2876_s3 + $0x6d] sm:$0xff]  ;;  %v2893_v24 = vrot.slane %v2871_v6, %v856_v8  ;;  %v2896_v25 = vrot.slane %v2871_v6, %v908_v9  ;;  %v2903_v31 = vrot.slane %v2871_v6, %v960_v12  ;;  %s3199_s14 = scalar_lea.vmem (%p3130_p7), %s2672_s22, %s1679_s20 [#allocation3]  ;;  %s3213_s24 = scalar_lea.vmem (%p3130_p7), %s2686_s17, %s1679_s20 [#allocation11] }
 0x1c1   : >>> { %v792_v20 = vld [vmem:[%s2876_s3 + $0x65] sm:$0xff]  ;;  %v795_v23 = vld [vmem:[%s2876_s3 + $0x8d] sm:$0xff]  ;;  %v2906_v32 = vrot.slane %v2871_v6, %v1012_v10  ;;  %v2909_v33 = vrot.slane %v2871_v6, %v1064_v13  ;;  %s756_s18 = sadd.s32 (%p3130_p7), 1, %s2333_s18  }
 0x1c2   : >>> { %v794_v22 = vld [vmem:[%s2876_s3 + $0x85] sm:$0xff]  ;;  %v797_v28 = vld [vmem:[%s2876_s3 + $0xad] sm:$0xff]  ;;  %v806_v30 = vmul.f32 %v805_v17, %v786_v11  ;;  %v807_v37 = vmul.f32 %v805_v17, %v787_v14  ;;  %v808_v38 = vmul.f32 %v805_v17, %v788_v15  ;;  %v809_v39 = vmul.f32 %v805_v17, %v789_v16  ;;  %p753_p13 = scmp.ge.s32.totalorder (%p3130_p7), %s756_s18, 2  }
 0x1c3   : >>> { %v796_v27 = vld [vmem:[%s2876_s3 + $0xa5] sm:$0xff]  ;;  %v799_v34 = vld [vmem:[%s2876_s3 + $0xcd] sm:$0xff]  ;;  %v810_v40 = vmul.f32 %v805_v17, %v790_v18  ;;  %v811_v41 = vmul.f32 %v805_v17, %v791_v19  ;;  %v812_v42 = vmul.f32 %v805_v17, %v792_v20  ;;  %v813_v43 = vmul.f32 %v805_v17, %v793_v21 }
 0x1c4   : >>> { %v798_v29 = vld [vmem:[%s2876_s3 + $0xc5] sm:$0xff]  ;;  %v801_v36 = vld [vmem:[%s2876_s3 + $0xed] sm:$0xff]  ;;  %v814_v44 = vmul.f32 %v805_v17, %v794_v22  ;;  %v815_v45 = vmul.f32 %v805_v17, %v795_v23  ;;  %v816_v46 = vmul.f32 %v805_v17, %v796_v27  ;;  %v817_v47 = vmul.f32 %v805_v17, %v797_v28 }
 0x1c5   : >>> { %v800_v35 = vld [vmem:[%s2876_s3 + $0xe5] sm:$0xff]  ;;  %v818_v48 = vmul.f32 %v805_v17, %v798_v29  ;;  %v819_v49 = vmul.f32 %v805_v17, %v799_v34  ;;  %v821_v51 = vmul.f32 %v805_v17, %v801_v36  ;;  %v822_v4 = vadd.f32 %v2397_v3, %v806_v30  ;;  %v839_v10 = vld [vmem:[%s2876_s3 + $0xe] sm:$0xff] }
 0x1c6   : >>> { %v820_v50 = vmul.f32 %v805_v17, %v800_v35  ;;  %v838_v7 = vld [vmem:[%s2876_s3 + $0x6] sm:$0xff]  ;;  %v823_v8 = vadd.f32 %v2393_v2, %v807_v37  ;;  %v824_v9 = vadd.f32 %v2389_v1, %v808_v38  ;;  %v825_v11 = vadd.f32 %v2385_v0, %v809_v39  ;;  %v841_v14 = vld [vmem:[%s2876_s3 + $0x2e] sm:$0xff] }
 0x1c7   : >>> { %v826_v12 = vadd.f32 %v2381_v63, %v810_v40  ;;  %v840_v13 = vld [vmem:[%s2876_s3 + $0x26] sm:$0xff]  ;;  %v827_v15 = vadd.f32 %v2377_v62, %v811_v41  ;;  %v828_v16 = vadd.f32 %v2373_v61, %v812_v42  ;;  %v829_v17 = vadd.f32 %v2369_v60, %v813_v43  ;;  %v843_v1 = vld [vmem:[%s2876_s3 + $0x4e] sm:$0xff] }
 0x1c8   : >>> { %v830_v2 = vadd.f32 %v2365_v59, %v814_v44  ;;  %v842_v0 = vld [vmem:[%s2876_s3 + $0x46] sm:$0xff]  ;;  %v831_v3 = vadd.f32 %v2361_v58, %v815_v45  ;;  %v832_v18 = vadd.f32 %v2357_v57, %v816_v46  ;;  %v833_v62 = vadd.f32 %v2353_v56, %v817_v47  ;;  %v845_v19 = vld [vmem:[%s2876_s3 + $0x6e] sm:$0xff] }
 0x1c9   : >>> { %v844_v63 = vld [vmem:[%s2876_s3 + $0x66] sm:$0xff]  ;;  %v834_v61 = vadd.f32 %v2349_v55, %v818_v48  ;;  %v847_v20 = vld [vmem:[%s2876_s3 + $0x8e] sm:$0xff]  ;;  %v835_v59 = vadd.f32 %v2345_v54, %v819_v49  ;;  %v836_v21 = vadd.f32 %v2341_v53, %v820_v50  ;;  %v837_v22 = vadd.f32 %v2337_v52, %v821_v51 }
 0x1ca   : >>> { %v846_v60 = vld [vmem:[%s2876_s3 + $0x86] sm:$0xff]  ;;  %v849_v27 = vld [vmem:[%s2876_s3 + $0xae] sm:$0xff]  ;;  %v858_v58 = vmul.f32 %v2893_v24, %v838_v7  ;;  %v859_v56 = vmul.f32 %v2893_v24, %v839_v10  ;;  %v860_v55 = vmul.f32 %v2893_v24, %v840_v13  ;;  %v861_v34 = vmul.f32 %v2893_v24, %v841_v14 }
 0x1cb   : >>> { %v848_v23 = vld [vmem:[%s2876_s3 + $0xa6] sm:$0xff]  ;;  %v851_v29 = vld [vmem:[%s2876_s3 + $0xce] sm:$0xff]  ;;  %v862_v54 = vmul.f32 %v2893_v24, %v842_v0  ;;  %v863_v53 = vmul.f32 %v2893_v24, %v843_v1  ;;  %v864_v52 = vmul.f32 %v2893_v24, %v844_v63  ;;  %v865_v35 = vmul.f32 %v2893_v24, %v845_v19 }
 0x1cc   : >>> { %v850_v28 = vld [vmem:[%s2876_s3 + $0xc6] sm:$0xff]  ;;  %v853_v30 = vld [vmem:[%s2876_s3 + $0xee] sm:$0xff]  ;;  %v866_v36 = vmul.f32 %v2893_v24, %v846_v60  ;;  %v867_v37 = vmul.f32 %v2893_v24, %v847_v20  ;;  %v868_v38 = vmul.f32 %v2893_v24, %v848_v23  ;;  %v869_v39 = vmul.f32 %v2893_v24, %v849_v27 }
 0x1cd   : >>> { %v852_v57 = vld [vmem:[%s2876_s3 + $0xe6] sm:$0xff]  ;;  %v870_v40 = vmul.f32 %v2893_v24, %v850_v28  ;;  %v871_v41 = vmul.f32 %v2893_v24, %v851_v29  ;;  %v873_v43 = vmul.f32 %v2893_v24, %v853_v30  ;;  %v874_v44 = vadd.f32 %v858_v58, %v822_v4  ;;  %v891_v50 = vld [vmem:[%s2876_s3 + $0xf] sm:$0xff] }
 0x1ce   : >>> { %v872_v42 = vmul.f32 %v2893_v24, %v852_v57  ;;  %v890_v45 = vld [vmem:[%s2876_s3 + $0x7] sm:$0xff]  ;;  %v875_v46 = vadd.f32 %v859_v56, %v823_v8  ;;  %v876_v47 = vadd.f32 %v860_v55, %v824_v9  ;;  %v877_v48 = vadd.f32 %v861_v34, %v825_v11  ;;  %v893_v7 = vld [vmem:[%s2876_s3 + $0x2f] sm:$0xff] }
 0x1cf   : >>> { %v878_v49 = vadd.f32 %v862_v54, %v826_v12  ;;  %v892_v51 = vld [vmem:[%s2876_s3 + $0x27] sm:$0xff]  ;;  %v879_v10 = vadd.f32 %v863_v53, %v827_v15  ;;  %v880_v13 = vadd.f32 %v864_v52, %v828_v16  ;;  %v881_v14 = vadd.f32 %v865_v35, %v829_v17  ;;  %v895_v4 = vld [vmem:[%s2876_s3 + $0x4f] sm:$0xff] }
 0x1d0   : >>> { %v882_v0 = vadd.f32 %v866_v36, %v830_v2  ;;  %v894_v24 = vld [vmem:[%s2876_s3 + $0x47] sm:$0xff]  ;;  %v883_v9 = vadd.f32 %v867_v37, %v831_v3  ;;  %v884_v11 = vadd.f32 %v868_v38, %v832_v18  ;;  %v885_v12 = vadd.f32 %v869_v39, %v833_v62  ;;  %v897_v63 = vld [vmem:[%s2876_s3 + $0x6f] sm:$0xff] }
 0x1d1   : >>> { %v896_v8 = vld [vmem:[%s2876_s3 + $0x67] sm:$0xff]  ;;  %v886_v1 = vadd.f32 %v870_v40, %v834_v61  ;;  %v899_v60 = vld [vmem:[%s2876_s3 + $0x8f] sm:$0xff]  ;;  %v887_v15 = vadd.f32 %v871_v41, %v835_v59  ;;  %v888_v16 = vadd.f32 %v872_v42, %v836_v21  ;;  %v889_v20 = vadd.f32 %v873_v43, %v837_v22 }
 0x1d2   : >>> { %v898_v19 = vld [vmem:[%s2876_s3 + $0x87] sm:$0xff]  ;;  %v901_v23 = vld [vmem:[%s2876_s3 + $0xaf] sm:$0xff]  ;;  %v910_v27 = vmul.f32 %v2896_v25, %v890_v45  ;;  %v911_v3 = vmul.f32 %v2896_v25, %v891_v50  ;;  %v912_v18 = vmul.f32 %v2896_v25, %v892_v51  ;;  %v913_v62 = vmul.f32 %v2896_v25, %v893_v7 }
 0x1d3   : >>> { %v900_v17 = vld [vmem:[%s2876_s3 + $0xa7] sm:$0xff]  ;;  %v903_v28 = vld [vmem:[%s2876_s3 + $0xcf] sm:$0xff]  ;;  %v914_v61 = vmul.f32 %v2896_v25, %v894_v24  ;;  %v915_v59 = vmul.f32 %v2896_v25, %v895_v4  ;;  %v916_v21 = vmul.f32 %v2896_v25, %v896_v8  ;;  %v917_v22 = vmul.f32 %v2896_v25, %v897_v63 }
 0x1d4   : >>> { %v902_v2 = vld [vmem:[%s2876_s3 + $0xc7] sm:$0xff]  ;;  %v905_v29 = vld [vmem:[%s2876_s3 + $0xef] sm:$0xff]  ;;  %v918_v57 = vmul.f32 %v2896_v25, %v898_v19  ;;  %v919_v30 = vmul.f32 %v2896_v25, %v899_v60  ;;  %v920_v56 = vmul.f32 %v2896_v25, %v900_v17  ;;  %v921_v55 = vmul.f32 %v2896_v25, %v901_v23 }
 0x1d5   : >>> { %v904_v58 = vld [vmem:[%s2876_s3 + $0xe7] sm:$0xff]  ;;  %v922_v34 = vmul.f32 %v2896_v25, %v902_v2  ;;  %v923_v54 = vmul.f32 %v2896_v25, %v903_v28  ;;  %v925_v52 = vmul.f32 %v2896_v25, %v905_v29  ;;  %v926_v35 = vadd.f32 %v910_v27, %v874_v44  ;;  %v943_v41 = vld [vmem:[%s2876_s3 + $0x10] sm:$0xff] }
 0x1d6   : >>> { %v924_v53 = vmul.f32 %v2896_v25, %v904_v58  ;;  %v942_v36 = vld [vmem:[%s2876_s3 + $0x8] sm:$0xff]  ;;  %v927_v37 = vadd.f32 %v911_v3, %v875_v46  ;;  %v928_v38 = vadd.f32 %v912_v18, %v876_v47  ;;  %v929_v39 = vadd.f32 %v913_v62, %v877_v48  ;;  %v945_v43 = vld [vmem:[%s2876_s3 + $0x30] sm:$0xff] }
 0x1d7   : >>> { %v930_v40 = vadd.f32 %v914_v61, %v878_v49  ;;  %v944_v42 = vld [vmem:[%s2876_s3 + $0x28] sm:$0xff]  ;;  %v931_v45 = vadd.f32 %v915_v59, %v879_v10  ;;  %v932_v50 = vadd.f32 %v916_v21, %v880_v13  ;;  %v933_v51 = vadd.f32 %v917_v22, %v881_v14  ;;  %v947_v44 = vld [vmem:[%s2876_s3 + $0x50] sm:$0xff] }
 0x1d8   : >>> { %v934_v7 = vadd.f32 %v918_v57, %v882_v0  ;;  %v946_v25 = vld [vmem:[%s2876_s3 + $0x48] sm:$0xff]  ;;  %v935_v47 = vadd.f32 %v919_v30, %v883_v9  ;;  %v936_v48 = vadd.f32 %v920_v56, %v884_v11  ;;  %v937_v49 = vadd.f32 %v921_v55, %v885_v12  ;;  %v949_v4 = vld [vmem:[%s2876_s3 + $0x70] sm:$0xff] }
 0x1d9   : >>> { %v948_v46 = vld [vmem:[%s2876_s3 + $0x68] sm:$0xff]  ;;  %v938_v24 = vadd.f32 %v922_v34, %v886_v1  ;;  %v951_v63 = vld [vmem:[%s2876_s3 + $0x90] sm:$0xff]  ;;  %v939_v10 = vadd.f32 %v923_v54, %v887_v15  ;;  %v940_v13 = vadd.f32 %v924_v53, %v888_v16  ;;  %v941_v19 = vadd.f32 %v925_v52, %v889_v20 }
 0x1da   : >>> { %v950_v8 = vld [vmem:[%s2876_s3 + $0x88] sm:$0xff]  ;;  %v953_v60 = vld [vmem:[%s2876_s3 + $0xb0] sm:$0xff]  ;;  %v962_v17 = vmul.f32 %v2903_v31, %v942_v36  ;;  %v963_v9 = vmul.f32 %v2903_v31, %v943_v41  ;;  %v964_v11 = vmul.f32 %v2903_v31, %v944_v42  ;;  %v965_v12 = vmul.f32 %v2903_v31, %v945_v43 }
 0x1db   : >>> { %v952_v14 = vld [vmem:[%s2876_s3 + $0xa8] sm:$0xff]  ;;  %v955_v23 = vld [vmem:[%s2876_s3 + $0xd0] sm:$0xff]  ;;  %v966_v1 = vmul.f32 %v2903_v31, %v946_v25  ;;  %v967_v15 = vmul.f32 %v2903_v31, %v947_v44  ;;  %v968_v16 = vmul.f32 %v2903_v31, %v948_v46  ;;  %v969_v20 = vmul.f32 %v2903_v31, %v949_v4 }
 0x1dc   : >>> { %v954_v0 = vld [vmem:[%s2876_s3 + $0xc8] sm:$0xff]  ;;  %v957_v27 = vld [vmem:[%s2876_s3 + $0xf0] sm:$0xff]  ;;  %v970_v28 = vmul.f32 %v2903_v31, %v950_v8  ;;  %v971_v58 = vmul.f32 %v2903_v31, %v951_v63  ;;  %v972_v29 = vmul.f32 %v2903_v31, %v952_v14  ;;  %v973_v3 = vmul.f32 %v2903_v31, %v953_v60 }
 0x1dd   : >>> { %v956_v2 = vld [vmem:[%s2876_s3 + $0xe8] sm:$0xff]  ;;  %v974_v18 = vmul.f32 %v2903_v31, %v954_v0  ;;  %v975_v62 = vmul.f32 %v2903_v31, %v955_v23  ;;  %v977_v59 = vmul.f32 %v2903_v31, %v957_v27  ;;  %v978_v21 = vadd.f32 %v962_v17, %v926_v35  ;;  %v995_v34 = vld [vmem:[%s2876_s3 + $0x11] sm:$0xff] }
 0x1de   : >>> { %v976_v61 = vmul.f32 %v2903_v31, %v956_v2  ;;  %v994_v22 = vld [vmem:[%s2876_s3 + $0x9] sm:$0xff]  ;;  %v979_v57 = vadd.f32 %v963_v9, %v927_v37  ;;  %v980_v30 = vadd.f32 %v964_v11, %v928_v38  ;;  %v981_v56 = vadd.f32 %v965_v12, %v929_v39  ;;  %v997_v53 = vld [vmem:[%s2876_s3 + $0x31] sm:$0xff] }
 0x1df   : >>> { %v982_v55 = vadd.f32 %v966_v1, %v930_v40  ;;  %v996_v54 = vld [vmem:[%s2876_s3 + $0x29] sm:$0xff]  ;;  %v983_v52 = vadd.f32 %v967_v15, %v931_v45  ;;  %v984_v36 = vadd.f32 %v968_v16, %v932_v50  ;;  %v985_v41 = vadd.f32 %v969_v20, %v933_v51  ;;  %v999_v35 = vld [vmem:[%s2876_s3 + $0x51] sm:$0xff] }
 0x1e0   : >>> { %v986_v42 = vadd.f32 %v970_v28, %v934_v7  ;;  %v998_v31 = vld [vmem:[%s2876_s3 + $0x49] sm:$0xff]  ;;  %v987_v38 = vadd.f32 %v971_v58, %v935_v47  ;;  %v988_v39 = vadd.f32 %v972_v29, %v936_v48  ;;  %v989_v40 = vadd.f32 %v973_v3, %v937_v49  ;;  %v1001_v25 = vld [vmem:[%s2876_s3 + $0x71] sm:$0xff] }
 0x1e1   : >>> { %v1000_v37 = vld [vmem:[%s2876_s3 + $0x69] sm:$0xff]  ;;  %v990_v43 = vadd.f32 %v974_v18, %v938_v24  ;;  %v1003_v46 = vld [vmem:[%s2876_s3 + $0x91] sm:$0xff]  ;;  %v991_v45 = vadd.f32 %v975_v62, %v939_v10  ;;  %v992_v50 = vadd.f32 %v976_v61, %v940_v13  ;;  %v993_v4 = vadd.f32 %v977_v59, %v941_v19 }
 0x1e2   : >>> { %v1002_v44 = vld [vmem:[%s2876_s3 + $0x89] sm:$0xff]  ;;  %v1005_v8 = vld [vmem:[%s2876_s3 + $0xb1] sm:$0xff]  ;;  %v1014_v63 = vmul.f32 %v2906_v32, %v994_v22  ;;  %v1015_v47 = vmul.f32 %v2906_v32, %v995_v34  ;;  %v1016_v48 = vmul.f32 %v2906_v32, %v996_v54  ;;  %v1017_v49 = vmul.f32 %v2906_v32, %v997_v53 }
 0x1e3   : >>> { %v1004_v51 = vld [vmem:[%s2876_s3 + $0xa9] sm:$0xff]  ;;  %v1007_v14 = vld [vmem:[%s2876_s3 + $0xd1] sm:$0xff]  ;;  %v1018_v24 = vmul.f32 %v2906_v32, %v998_v31  ;;  %v1019_v10 = vmul.f32 %v2906_v32, %v999_v35  ;;  %v1020_v13 = vmul.f32 %v2906_v32, %v1000_v37  ;;  %v1021_v19 = vmul.f32 %v2906_v32, %v1001_v25 }
 0x1e4   : >>> { %v1006_v7 = vld [vmem:[%s2876_s3 + $0xc9] sm:$0xff]  ;;  %v1009_v0 = vld [vmem:[%s2876_s3 + $0xf1] sm:$0xff]  ;;  %v1022_v17 = vmul.f32 %v2906_v32, %v1002_v44  ;;  %v1023_v23 = vmul.f32 %v2906_v32, %v1003_v46  ;;  %v1024_v2 = vmul.f32 %v2906_v32, %v1004_v51  ;;  %v1025_v27 = vmul.f32 %v2906_v32, %v1005_v8 }
 0x1e5   : >>> { %v1008_v60 = vld [vmem:[%s2876_s3 + $0xe9] sm:$0xff]  ;;  %v1026_v9 = vmul.f32 %v2906_v32, %v1006_v7  ;;  %v1027_v11 = vmul.f32 %v2906_v32, %v1007_v14  ;;  %v1029_v1 = vmul.f32 %v2906_v32, %v1009_v0  ;;  %v1030_v15 = vadd.f32 %v1014_v63, %v978_v21  ;;  %v1047_v3 = vld [vmem:[%s2876_s3 + $0x12] sm:$0xff] }
 0x1e6   : >>> { %v1028_v12 = vmul.f32 %v2906_v32, %v1008_v60  ;;  %v1046_v16 = vld [vmem:[%s2876_s3 + $0xa] sm:$0xff]  ;;  %v1031_v20 = vadd.f32 %v1015_v47, %v979_v57  ;;  %v1032_v28 = vadd.f32 %v1016_v48, %v980_v30  ;;  %v1033_v58 = vadd.f32 %v1017_v49, %v981_v56  ;;  %v1049_v62 = vld [vmem:[%s2876_s3 + $0x32] sm:$0xff] }
 0x1e7   : >>> { %v1034_v29 = vadd.f32 %v1018_v24, %v982_v55  ;;  %v1048_v18 = vld [vmem:[%s2876_s3 + $0x2a] sm:$0xff]  ;;  %v1035_v61 = vadd.f32 %v1019_v10, %v983_v52  ;;  %v1036_v59 = vadd.f32 %v1020_v13, %v984_v36  ;;  %v1037_v22 = vadd.f32 %v1021_v19, %v985_v41  ;;  %v1051_v21 = vld [vmem:[%s2876_s3 + $0x52] sm:$0xff] }
 0x1e8   : >>> { %v1038_v34 = vadd.f32 %v1022_v17, %v986_v42  ;;  %v1050_v32 = vld [vmem:[%s2876_s3 + $0x4a] sm:$0xff]  ;;  %v1039_v30 = vadd.f32 %v1023_v23, %v987_v38  ;;  %v1040_v56 = vadd.f32 %v1024_v2, %v988_v39  ;;  %v1041_v55 = vadd.f32 %v1025_v27, %v989_v40  ;;  %v1053_v53 = vld [vmem:[%s2876_s3 + $0x72] sm:$0xff] }
 0x1e9   : >>> { %v1052_v57 = vld [vmem:[%s2876_s3 + $0x6a] sm:$0xff]  ;;  %v1042_v54 = vadd.f32 %v1026_v9, %v990_v43  ;;  %v1055_v35 = vld [vmem:[%s2876_s3 + $0x92] sm:$0xff]  ;;  %v1043_v52 = vadd.f32 %v1027_v11, %v991_v45  ;;  %v1044_v36 = vadd.f32 %v1028_v12, %v992_v50  ;;  %v1045_v37 = vadd.f32 %v1029_v1, %v993_v4 }
 0x1ea   : >>> { %v1054_v31 = vld [vmem:[%s2876_s3 + $0x8a] sm:$0xff]  ;;  %v1057_v25 = vld [vmem:[%s2876_s3 + $0xb2] sm:$0xff]  ;;  %v1066_v44 = vmul.f32 %v2909_v33, %v1046_v16  ;;  %v1067_v38 = vmul.f32 %v2909_v33, %v1047_v3  ;;  %v1068_v39 = vmul.f32 %v2909_v33, %v1048_v18  ;;  %v1069_v40 = vmul.f32 %v2909_v33, %v1049_v62 }
 0x1eb   : >>> { %v1056_v41 = vld [vmem:[%s2876_s3 + $0xaa] sm:$0xff]  ;;  %v1059_v46 = vld [vmem:[%s2876_s3 + $0xd2] sm:$0xff]  ;;  %v1070_v43 = vmul.f32 %v2909_v33, %v1050_v32  ;;  %v1071_v45 = vmul.f32 %v2909_v33, %v1051_v21  ;;  %v1072_v50 = vmul.f32 %v2909_v33, %v1052_v57  ;;  %v1073_v4 = vmul.f32 %v2909_v33, %v1053_v53 }
 0x1ec   : >>> { %v1058_v42 = vld [vmem:[%s2876_s3 + $0xca] sm:$0xff]  ;;  %v1061_v8 = vld [vmem:[%s2876_s3 + $0xf2] sm:$0xff]  ;;  %v1074_v7 = vmul.f32 %v2909_v33, %v1054_v31  ;;  %v1075_v63 = vmul.f32 %v2909_v33, %v1055_v35  ;;  %v1076_v14 = vmul.f32 %v2909_v33, %v1056_v41  ;;  %v1077_v60 = vmul.f32 %v2909_v33, %v1057_v25 }
 0x1ed   : >>> { %v1060_v51 = vld [vmem:[%s2876_s3 + $0xea] sm:$0xff]  ;;  %v1078_v0 = vmul.f32 %v2909_v33, %v1058_v42  ;;  %v1079_v47 = vmul.f32 %v2909_v33, %v1059_v46  ;;  %v1081_v49 = vmul.f32 %v2909_v33, %v1061_v8  ;;  %v1082_v24 = vadd.f32 %v1066_v44, %v1030_v15  ;;  %v1099_v2 = vld [vmem:[%s2876_s3 + $0x13] sm:$0xff] }
 0x1ee   : >>> { %v1080_v48 = vmul.f32 %v2909_v33, %v1060_v51  ;;  %v1098_v10 = vld [vmem:[%s2876_s3 + $0xb] sm:$0xff]  ;;  %v1083_v13 = vadd.f32 %v1067_v38, %v1031_v20  ;;  %v1084_v19 = vadd.f32 %v1068_v39, %v1032_v28  ;;  %v1085_v17 = vadd.f32 %v1069_v40, %v1033_v58  ;;  %v1101_v9 = vld [vmem:[%s2876_s3 + $0x33] sm:$0xff] }
 0x1ef   : >>> { %v1086_v23 = vadd.f32 %v1070_v43, %v1034_v29  ;;  %v1100_v27 = vld [vmem:[%s2876_s3 + $0x2b] sm:$0xff]  ;;  %v1087_v11 = vadd.f32 %v1071_v45, %v1035_v61  ;;  %v1088_v12 = vadd.f32 %v1072_v50, %v1036_v59  ;;  %v1089_v1 = vadd.f32 %v1073_v4, %v1037_v22  ;;  %v1103_v15 = vld [vmem:[%s2876_s3 + $0x53] sm:$0xff] }
 0x1f0   : >>> { %v1090_v16 = vadd.f32 %v1074_v7, %v1038_v34  ;;  %v1102_v33 = vld [vmem:[%s2876_s3 + $0x4b] sm:$0xff]  ;;  %v1091_v28 = vadd.f32 %v1075_v63, %v1039_v30  ;;  %v1092_v58 = vadd.f32 %v1076_v14, %v1040_v56  ;;  %v1093_v29 = vadd.f32 %v1077_v60, %v1041_v55  ;;  %v1105_v3 = vld [vmem:[%s2876_s3 + $0x73] sm:$0xff] }
 0x1f1   : >>> { %v1104_v20 = vld [vmem:[%s2876_s3 + $0x6b] sm:$0xff]  ;;  %v1107_v62 = vld [vmem:[%s2876_s3 + $0x93] sm:$0xff]  ;;  %v1117_v61 = vrot.slane %v2871_v6, %v1116_v26  ;;  %v1094_v59 = vadd.f32 %v1078_v0, %v1042_v54  ;;  %v1095_v22 = vadd.f32 %v1079_v47, %v1043_v52  ;;  %v1096_v34 = vadd.f32 %v1080_v48, %v1044_v36 }
 0x1f2   : >>> { %v1106_v18 = vld [vmem:[%s2876_s3 + $0x8b] sm:$0xff]  ;;  %v1097_v32 = vadd.f32 %v1081_v49, %v1045_v37  ;;  %v1109_v57 = vld [vmem:[%s2876_s3 + $0xb3] sm:$0xff] }
 0x1f3   : >>> { %v1108_v21 = vld [vmem:[%s2876_s3 + $0xab] sm:$0xff]  ;;  %v1111_v31 = vld [vmem:[%s2876_s3 + $0xd3] sm:$0xff]  ;;  %v1118_v41 = vmul.f32 %v1117_v61, %v1098_v10  ;;  %v1119_v56 = vmul.f32 %v1117_v61, %v1099_v2  ;;  %v1120_v55 = vmul.f32 %v1117_v61, %v1100_v27  ;;  %v1121_v25 = vmul.f32 %v1117_v61, %v1101_v9 }
 0x1f4   : >>> { %v1110_v53 = vld [vmem:[%s2876_s3 + $0xcb] sm:$0xff]  ;;  %v1113_v30 = vld [vmem:[%s2876_s3 + $0xf3] sm:$0xff]  ;;  %v1122_v42 = vmul.f32 %v1117_v61, %v1102_v33  ;;  %v1123_v44 = vmul.f32 %v1117_v61, %v1103_v15  ;;  %v1124_v46 = vmul.f32 %v1117_v61, %v1104_v20  ;;  %v1125_v5 = vmul.f32 %v1117_v61, %v1105_v3 }
 0x1f5   : >>> { %v1112_v35 = vld [vmem:[%s2876_s3 + $0xeb] sm:$0xff]  ;;  %v1126_v51 = vmul.f32 %v1117_v61, %v1106_v18  ;;  %v1127_v6 = vmul.f32 %v1117_v61, %v1107_v62  ;;  %v1128_v26 = vmul.f32 %v1117_v61, %v1108_v21  ;;  %v1129_v54 = vmul.f32 %v1117_v61, %v1109_v57  ;;  %v2057_v15 = vld [vmem:[#allocation9 + $0x20] sm:$0xff] (%p3130_p7)  }
 0x1f6   : >>> { %v1130_v52 = vmul.f32 %v1117_v61, %v1110_v53  ;;  %v1131_v36 = vmul.f32 %v1117_v61, %v1111_v31  ;;  %v1132_v37 = vmul.f32 %v1117_v61, %v1112_v35  ;;  %v1133_v8 = vmul.f32 %v1117_v61, %v1113_v30  ;;  %v2055_v27 = vld [vmem:[#allocation9 + $0x10] sm:$0xff] (%p3130_p7)   ;;  %v2056_v9 = vld [vmem:[#allocation9 + $0x18] sm:$0xff] (%p3130_p7)  }
 0x1f7   : >>> { %v1134_v38 = vadd.f32 %v1118_v41, %v1082_v24   ;;  %v1135_v39 = vadd.f32 %v1119_v56, %v1083_v13   ;;  %v3105_v40 = vadd.f32 %v1120_v55, %v1084_v19   ;;  %v3107_v0 = vadd.f32 %v1121_v25, %v1085_v17   ;;  %v2053_v17 = vld [vmem:[#allocation9] sm:$0xff] (%p3130_p7)   ;;  %v2060_v21 = vld [vmem:[#allocation9 + $0x38] sm:$0xff] (%p3130_p7)  }
 0x1f8   : >>> { %v3109_v63 = vadd.f32 %v1122_v42, %v1086_v23   ;;  %v3111_v62 = vadd.f32 %v1123_v44, %v1087_v11   ;;  %v3113_v61 = vadd.f32 %v1124_v46, %v1088_v12   ;;  %v3115_v60 = vadd.f32 %v1125_v5, %v1089_v1   ;;  %v2054_v23 = vld [vmem:[#allocation9 + $0x8] sm:$0xff] (%p3130_p7)   ;;  %1745 = vmatprep.subr.bf16.mxu0 (%p3130_p7), %v2053_v17 }
 0x1f9   : >>> { %v3351_v43 = vmov %v3107_v0  ;;  %v1142_v14 = vadd.f32 %v1126_v51, %v1090_v16   ;;  %v1143_v47 = vadd.f32 %v1127_v6, %v1091_v28   ;;  %v3117_v57 = vadd.f32 %v1128_v26, %v1092_v58   ;;  %1793 = vmatprep.subr.bf16.mxu1 (%p3130_p7), %v2053_v17  ;;  %1746 = vmatpush3.bf16.msra.mxu0 (%p3130_p7), %v2053_v17  ;;  %v1660_v11 = vld [vmem:[%s3317_s6] ss:$0 sm:$0xff] (%p3130_p7) }
 0x1fa   : >>> { %v3352_v45 = vmov %v3109_v63  ;;  %v3353_v50 = vmov %v3111_v62  ;;  %v3354_v4 = vmov %v3113_v61  ;;  %v3355_v7 = vmov %v3115_v60  ;;  %1801 = vmatpush3.bf16.msra.mxu1 (%p3130_p7), %v2053_v17  ;;  %1747 = vmatprep.subr.bf16.mxu0 (%p3130_p7), %v2054_v23 }
 0x1fb   : >>> { %v3356_v48 = vmov %v3117_v57  ;;  %v3119_v56 = vadd.f32 %v1129_v54, %v1093_v29   ;;  %v3121_v55 = vadd.f32 %v1130_v52, %v1094_v59   ;;  %v3123_v54 = vadd.f32 %v1131_v36, %v1095_v22   ;;  %762 = sbr.rel (!%p3130_p7) target bundleno = 442 (0x1ba), region = 156  ;;  %1794 = vmatprep.subr.bf16.mxu1 (%p3130_p7), %v2054_v23  ;;  %v2059_v29 = vld [vmem:[#allocation9 + $0x30] sm:$0xff] (%p3130_p7)  }
 0x1fc   : >>> { %v3125_v53 = vadd.f32 %v1132_v37, %v1096_v34   ;;  %v3127_v52 = vadd.f32 %v1133_v8, %v1097_v32   ;;  %v3368_v57 = vmov %v3356_v48  ;;  %v3369_v58 = vmov %v1143_v47 }
 0x1fd   : >>> { %v3357_v49 = vmov %v3119_v56  ;;  %v3358_v24 = vmov %v3121_v55  ;;  %v3359_v10 = vmov %v3123_v54  ;;  %v3370_v59 = vmov %v1142_v14  ;;  %1748 = vmatpush3.bf16.msra.mxu0 (%p3130_p7), %v2054_v23  ;;  %v2058_v58 = vld [vmem:[#allocation9 + $0x28] sm:$0xff] (%p3130_p7)  }
 0x1fe   : >>> { %v3360_v13 = vmov %v3125_v53  ;;  %v3361_v19 = vmov %v3127_v52  ;;  %v3365_v54 = vmov %v3359_v10  ;;  %v3366_v55 = vmov %v3358_v24  ;;  %1802 = vmatpush3.bf16.msra.mxu1 (%p3130_p7), %v2054_v23  ;;  %1749 = vmatprep.subr.bf16.mxu0 (%p3130_p7), %v2055_v27  ;;  %v1378_v23 = vld [vmem:[%s3199_s14 + $0x58] sm:$0xff] (%p3130_p7) }
 0x1ff   : >>> { %v3363_v52 = vmov %v3361_v19  ;;  %v3364_v53 = vmov %v3360_v13  ;;  %v3367_v56 = vmov %v3357_v49  ;;  %v3371_v60 = vmov %v3355_v7  ;;  %1795 = vmatprep.subr.bf16.mxu1 (%p3130_p7), %v2055_v27 }
 0x200   : >>> { %v3372_v61 = vmov %v3354_v4  ;;  %v3373_v62 = vmov %v3353_v50  ;;  %v3374_v63 = vmov %v3352_v45  ;;  %v3375_v0 = vmov %v3351_v43 }
 0x201   : >>> { %v3376_v1 = vmov %v3105_v40  ;;  %v3377_v2 = vmov %v1135_v39  ;;  %v3378_v3 = vmov %v1134_v38  ;;  %v1157_v12 = vadd.f32 (%p3130_p7), %v1660_v11, %v1134_v38  ;;  %1750 = vmatpush3.bf16.msra.mxu0 (%p3130_p7), %v2055_v27 }
 0x202   : >> { %v1158_v16 = vadd.f32 %v1660_v11, %v1135_v39  ;;  %v1165_v63 = vadd.f32 %v1660_v11, %v1142_v14  ;;  %v1166_v60 = vadd.f32 %v1660_v11, %v1143_v47  ;;  %1803 = vmatpush3.bf16.msra.mxu1 %v2055_v27  ;;  %1751 = vmatprep.subr.bf16.mxu0 %v2056_v9  ;;  %v3204_v39 = vld [vmem:[%s3319_s8] ss:$0 sm:$0xff]  ;;  %s1680_s30 = sshll.u32 (%p753_p13), %s2486_s13, 12  ;;  %s3379_s3 = sld [smem:[#allocation19_spill]] (%p753_p13) }
 0x203   : >> { %v1173_v0 = vmax.f32 %v1157_v12, 0.0  ;;  %1796 = vmatprep.subr.bf16.mxu1 %v2056_v9  ;;  %v1159_v3 = vadd.f32 %v1660_v11, %v3105_v40  ;;  %v1160_v18 = vadd.f32 %v1660_v11, %v3351_v43  ;;  %v1167_v62 = vadd.f32 %v1660_v11, %v3356_v48  ;;  %v1369_v43 = vld [vmem:[%s3199_s14 + $0x10] sm:$0xff]  ;;  %v1367_v47 = vld [vmem:[%s3199_s14] sm:$0xff]  ;;  %s1430_s26 = sshll.u32 (%p753_p13), %s2686_s17, 4  ;;  %s1417_s21 = scalar_lea.sflag (%p753_p13), [#allocation5], %s2668_s28  ;;  %s3267_s26 = int_to_ptr.vmem [resolvable:$true] %s1430_s26 }
 0x204   : >> { %v1174_v2 = vmax.f32 %v1158_v16, 0.0  ;;  %v1181_v1 = vmax.f32 %v1165_v63, 0.0  ;;  %v1182_v33 = vmax.f32 %v1166_v60, 0.0  ;;  %v1168_v61 = vadd.f32 %v1660_v11, %v3357_v49  ;;  %v1375_v49 = vld [vmem:[%s3199_s14 + $0x40] sm:$0xff]  ;;  %v1368_v63 = vld [vmem:[%s3199_s14 + $0x8] sm:$0xff]  ;;  %s2175_s20 = scalar_lea.vmem (%p753_p13), %s3267_s26, 4096 }
 0x205   : >> { %1752 = vmatpush3.bf16.msra.mxu0 %v2056_v9  ;;  %v1161_v59 = vadd.f32 %v1660_v11, %v3352_v45  ;;  %v1162_v22 = vadd.f32 %v1660_v11, %v3353_v50  ;;  %v1169_v34 = vadd.f32 %v1660_v11, %v3358_v24  ;;  %v1170_v32 = vadd.f32 %v1660_v11, %v3359_v10  ;;  %v1377_v50 = vld [vmem:[%s3199_s14 + $0x50] sm:$0xff]  ;;  %p2176_p1 = scmp.ne.s32.totalorder (%p753_p13), %s3267_s26, %s2175_s20  ;;  %s2412_s22 = smov (%p753_p13), [#allocation11]  }
 0x206   : >> { %v1189_v20 = vpack.c.bf16 %v1174_v2, %v1173_v0  ;;  %v1193_v28 = vpack.c.bf16 %v1182_v33, %v1181_v1  ;;  %1804 = vmatpush3.bf16.msra.mxu1 %v2056_v9  ;;  %1753 = vmatprep.subr.bf16.mxu0 %v2057_v15  ;;  %v1175_v57 = vmax.f32 %v1159_v3, 0.0  ;;  %v1176_v53 = vmax.f32 %v1160_v18, 0.0  ;;  %v1376_v0 = vld [vmem:[%s3199_s14 + $0x48] sm:$0xff]  ;;  %v1373_v18 = vld [vmem:[%s3199_s14 + $0x30] sm:$0xff]  ;;  %s2179_s18 = sshll.u32 (%p753_p13), %s2412_s22, 4  ;;  %s2180_s18 = int_to_ptr.vmem [resolvable:$false] %s2179_s18 }
 0x207   : >> { %1797 = vmatprep.subr.bf16.mxu1 %v2057_v15  ;;  %v1183_v31 = vmax.f32 %v1167_v62, 0.0  ;;  %v1184_v35 = vmax.f32 %v1168_v61, 0.0  ;;  %v1177_v30 = vmax.f32 %v1161_v59, 0.0  ;;  %v1178_v41 = vmax.f32 %v1162_v22, 0.0  ;;  %v1381_v61 = vld [vmem:[%s3199_s14 + $0x70] sm:$0xff]  ;;  %p2177_p2 = pnand (%p753_p13), %p2176_p1, %p2617_p5  ;;  %s2181_s13 = scalar_lea.vmem (%p753_p13), %s2180_s18, 8192 }
 0x208   : >> { %1761 = vmatprep.mubr.bf16.mxu0 %v1189_v20  ;;  %1769 = vmatprep.mubr.bf16.mxu1 %v1193_v28  ;;  %v1185_v56 = vmax.f32 %v1169_v34, 0.0  ;;  %v1186_v55 = vmax.f32 %v1170_v32, 0.0  ;;  %v1190_v25 = vpack.c.bf16 %v1176_v53, %v1175_v57  ;;  %v1163_v44 = vadd.f32 %v1660_v11, %v3354_v4  ;;  %v1371_v32 = vld [vmem:[%s3199_s14 + $0x20] sm:$0xff]  ;;  %s3264_s9 = scalar_lea.hbm (%p753_p13), %s3379_s3, %s1680_s30  ;;  %p2182_p10 = scmp.lt.s32.totalorder (%p753_p13), %s3267_s26, %s2180_s18 }
 0x209   : >> { %1754 = vmatpush3.bf16.msra.mxu0 %v2057_v15  ;;  %v1194_v42 = vpack.c.bf16 %v1184_v35, %v1183_v31  ;;  %v1164_v46 = vadd.f32 %v1660_v11, %v3355_v7  ;;  %v1171_v5 = vadd.f32 %v1660_v11, %v3360_v13  ;;  %v1172_v51 = vadd.f32 %v1660_v11, %v3361_v19  ;;  %v1370_v19 = vld [vmem:[%s3199_s14 + $0x18] sm:$0xff]  ;;  %v1379_v57 = vld [vmem:[%s3199_s14 + $0x60] sm:$0xff]  ;;  %p2178_p4 = pneg (%p753_p13), %p2177_p2  ;;  %p2183_p3 = scmp.lt.s32.totalorder (%p753_p13), %s2181_s13, %s2175_s20 }
 0x20a   : >> { %1805 = vmatpush3.bf16.msra.mxu1 %v2057_v15  ;;  %1755 = vmatprep.subr.bf16.mxu0 %v2058_v58  ;;  %v1191_v6 = vpack.c.bf16 %v1178_v41, %v1177_v30  ;;  %v1195_v26 = vpack.c.bf16 %v1186_v55, %v1185_v56  ;;  %v1179_v54 = vmax.f32 %v1163_v44, 0.0  ;;  %v1374_v30 = vld [vmem:[%s3199_s14 + $0x38] sm:$0xff] }
 0x20b   : >> { %1798 = vmatprep.subr.bf16.mxu1 %v2058_v58  ;;  %v1180_v52 = vmax.f32 %v1164_v46, 0.0  ;;  %v1187_v36 = vmax.f32 %v1171_v5, 0.0  ;;  %v1188_v37 = vmax.f32 %v1172_v51, 0.0  ;;  %v1382_v56 = vld [vmem:[%s3199_s14 + $0x78] sm:$0xff]  ;;  %v1372_v5 = vld [vmem:[%s3199_s14 + $0x28] sm:$0xff]  ;;  %p2184_p12 = por (%p753_p13), %p2183_p3, %p2182_p10 }
 0x20d   : >> { %1756 = vmatpush3.bf16.msra.mxu0 %v2058_v58  ;;  %v1192_v8 = vpack.c.bf16 %v1180_v52, %v1179_v54  ;;  %v1196_v38 = vpack.c.bf16 %v1188_v37, %v1187_v36  ;;  %p2185_p9 = pnand (%p753_p13), %p2184_p12, %p2178_p4 }
 0x20e   : >> { %1806 = vmatpush3.bf16.msra.mxu1 %v2058_v58  ;;  %1757 = vmatprep.subr.bf16.mxu0 %v2059_v29 }
 0x20f   : >> { %1799 = vmatprep.subr.bf16.mxu1 %v2059_v29 }
 0x211   : >> { %1758 = vmatpush3.bf16.msra.mxu0 %v2059_v29 }
 0x212   : >> { %1807 = vmatpush3.bf16.msra.mxu1 %v2059_v29  ;;  %1759 = vmatprep.subr.bf16.mxu0 %v2060_v21 }
 0x213   : >> { %1800 = vmatprep.subr.bf16.mxu1 %v2060_v21 }
 0x215   : >> { %1760 = vmatpush3.bf16.msra.mxu0 %v2060_v21 }
 0x216   : >> { %1808 = vmatpush3.bf16.msra.mxu1 %v2060_v21 }
 0x218   : >> { %1762 = vmatmul.mubr.bf16.vlgmr.msra.gmra.mrb[0].mxu0 %v1190_v25 }
 0x219   : >> { %1770 = vmatmul.mubr.bf16.vlgmr.msra.gmra.mrb[0].mxu1 %v1194_v42  ;;  %1765 = vmatprep.mubr.bf16.mxu0 %v1191_v6  ;;  %v1380_v6 = vld [vmem:[%s3199_s14 + $0x68] sm:$0xff] }
 0x21a   : >> { %1773 = vmatprep.mubr.bf16.mxu1 %v1195_v26 }
 0x220   : >> { %1766 = vmatmul.mubr.bf16.gmra.mrb[4].mxu0 %v1192_v8 }
 0x221   : >> { %1774 = vmatmul.mubr.bf16.gmra.mrb[4].mxu1 %v1196_v38 }
 0x2eb   : >> { %v1763_v40 = vpop.f32.mrb[0].mxu0 }
 0x2ec   : >> { %v1771_v45 = vpop.f32.mrb[0].mxu1  ;;  %v1311_v4 = vadd.f32 %v1763_v40, %v3204_v39  ;;  %v1302_v14 = vpop.f32.mrb[1].mxu0 }
 0x2ed   : >> { %v1343_v7 = vadd.f32 %v1771_v45, %v3204_v39  ;;  %v1334_v48 = vpop.f32.mrb[1].mxu1  ;;  %v1303_v24 = vadd.f32 %v3204_v39, %v1302_v14  ;;  %v1764_v13 = vpop.f32.mrb[2].mxu0 }
 0x2ee   : >> { %v1335_v10 = vadd.f32 %v3204_v39, %v1334_v48  ;;  %v1772_v17 = vpop.f32.mrb[2].mxu1  ;;  %v1385_v27 = vadd.f32 %v1369_v43, %v1311_v4  ;;  %v1314_v11 = vadd.f32 %v1764_v13, %v3204_v39  ;;  %v1305_v16 = vpop.f32.mrb[3].mxu0 }
 0x2ef   : >> { %v1393_v9 = vadd.f32 %v1377_v50, %v1343_v7  ;;  %v1346_v12 = vadd.f32 %v1772_v17, %v3204_v39  ;;  %v1337_v60 = vpop.f32.mrb[3].mxu1  ;;  %v1383_v2 = vadd.f32 %v1367_v47, %v1303_v24  ;;  %v1306_v33 = vadd.f32 %v3204_v39, %v1305_v16 }
 0x2f0   : >> { %v1391_v1 = vadd.f32 %v1375_v49, %v1335_v10  ;;  %v1338_v15 = vadd.f32 %v3204_v39, %v1337_v60  ;;  %1402 = vst [vmem:[%s3213_s24 + $0x10] sm:$0xff] %v1385_v27  ;;  %v1386_v20 = vadd.f32 %v1370_v19, %v1314_v11 }
 0x2f1   : >> { %1410 = vst [vmem:[%s3213_s24 + $0x50] sm:$0xff] %v1393_v9  ;;  %v1394_v28 = vadd.f32 %v1378_v23, %v1346_v12  ;;  %1400 = vst [vmem:[%s3213_s24] sm:$0xff] %v1383_v2  ;;  %v1384_v58 = vadd.f32 %v1368_v63, %v1306_v33 }
 0x2f2   : >> { %1408 = vst [vmem:[%s3213_s24 + $0x40] sm:$0xff] %v1391_v1  ;;  %v1392_v29 = vadd.f32 %v1376_v0, %v1338_v15  ;;  %1403 = vst [vmem:[%s3213_s24 + $0x18] sm:$0xff] %v1386_v20 }
 0x2f3   : >> { %1411 = vst [vmem:[%s3213_s24 + $0x58] sm:$0xff] %v1394_v28  ;;  %1401 = vst [vmem:[%s3213_s24 + $0x8] sm:$0xff] %v1384_v58  ;;  %v1767_v3 = vpop.f32.mrb[4].mxu0 }
 0x2f4   : >> { %1409 = vst [vmem:[%s3213_s24 + $0x48] sm:$0xff] %v1392_v29  ;;  %v1775_v62 = vpop.f32.mrb[4].mxu1  ;;  %v1327_v59 = vadd.f32 %v1767_v3, %v3204_v39  ;;  %v1318_v34 = vpop.f32.mrb[5].mxu0 }
 0x2f5   : >> { %v1359_v22 = vadd.f32 %v1775_v62, %v3204_v39  ;;  %v1350_v21 = vpop.f32.mrb[5].mxu1  ;;  %v1319_v53 = vadd.f32 %v3204_v39, %v1318_v34  ;;  %v1768_v35 = vpop.f32.mrb[6].mxu0 }
 0x2f6   : >> { %v1351_v31 = vadd.f32 %v3204_v39, %v1350_v21  ;;  %v1776_v41 = vpop.f32.mrb[6].mxu1  ;;  %v1389_v55 = vadd.f32 %v1373_v18, %v1327_v59  ;;  %v1330_v42 = vadd.f32 %v1768_v35, %v3204_v39  ;;  %v1321_v46 = vpop.f32.mrb[7].mxu0  ;;  %755 = sbr.rel (!%p753_p13) target bundleno = 438 (0x1b6), region = 167 }
 0x2f7   : >> { %v1397_v25 = vadd.f32 %v1381_v61, %v1359_v22  ;;  %v1362_v44 = vadd.f32 %v1776_v41, %v3204_v39  ;;  %v1353_v51 = vpop.f32.mrb[7].mxu1  ;;  %v1387_v26 = vadd.f32 %v1371_v32, %v1319_v53  ;;  %v1322_v52 = vadd.f32 %v3204_v39, %v1321_v46 }
 0x2f8   : >> { %v1395_v54 = vadd.f32 %v1379_v57, %v1351_v31  ;;  %v1354_v36 = vadd.f32 %v3204_v39, %v1353_v51  ;;  %1406 = vst [vmem:[%s3213_s24 + $0x30] sm:$0xff] %v1389_v55  ;;  %v1390_v37 = vadd.f32 %v1374_v30, %v1330_v42 }
 0x2f9   : >> { %1414 = vst [vmem:[%s3213_s24 + $0x70] sm:$0xff] %v1397_v25  ;;  %v1398_v8 = vadd.f32 %v1382_v56, %v1362_v44  ;;  %1404 = vst [vmem:[%s3213_s24 + $0x20] sm:$0xff] %v1387_v26  ;;  %v1388_v38 = vadd.f32 %v1372_v5, %v1322_v52 }
 0x2fa   : >> { %1412 = vst [vmem:[%s3213_s24 + $0x60] sm:$0xff] %v1395_v54  ;;  %v1396_v40 = vadd.f32 %v1380_v6, %v1354_v36  ;;  %1407 = vst [vmem:[%s3213_s24 + $0x38] sm:$0xff] %v1390_v37 }
 0x2fb   : >> { %1415 = vst [vmem:[%s3213_s24 + $0x78] sm:$0xff] %v1398_v8  ;;  %1405 = vst [vmem:[%s3213_s24 + $0x28] sm:$0xff] %v1388_v38 }
 0x2fc   : >> { %1413 = vst [vmem:[%s3213_s24 + $0x68] sm:$0xff] %v1396_v40 }
 0x2fd   : > { %2188 = shalt.err (!%p2185_p9)
}
 0x2fe   : > { %s2189_s17 = scalar_lea.hbm %s3264_s9, 4096  ;;  %s2193_s15 = scalar_lea.hbm %s3379_s3, 8192 }
 0x2ff   : > { %p2190_p0 = scmp.ne.s32.totalorder %s3264_s9, %s2189_s17  ;;  %p2194_p11 = scmp.lt.u32.totalorder %s3264_s9, %s3379_s3 }
 0x300   : > { %p2195_p7 = scmp.lt.u32.totalorder %s2193_s15, %s2189_s17  ;;  %p2197_p1 = scmp.lt.u32.totalorder %s2189_s17, %s3264_s9 }
 0x301   : > { %p2191_p6 = pnand %p2190_p0, %p2617_p5 }
 0x302   : > { %p2196_p13 = por %p2195_p7, %p2194_p11 }
 0x303   : > { %p2192_p8 = pneg %p2191_p6 }
 0x304   : > { %p2198_p2 = por %p2197_p1, %p2196_p13 }
 0x306   : > { %p2199_p4 = pnand %p2198_p2, %p2192_p8 }
 0x308   : > { %2202 = shalt.err (!%p2199_p4)
}
 0x309   : > { %s2413_s27 = smov 128   ;;  %s2414_s23 = smov 8  }
 0x30a   : > { %1823 = dma.vmem_to_hbm [thread:$0]  (%p2617_p5), %s3267_s26, 4096, %s3264_s9, %s1417_s21, %s2413_s27, %s2413_s27, %s2414_s23  }
 0x30b PF: > { %s3380_s20 = sld [smem:[#allocation16_spill]]  ;;  %s3381_s22 = sld [smem:[#allocation17_spill]] }
 0x30c   : > { %p3383_p3 = scmp.ge.s32.totalorder %s2325_s12, 2 }
 0x311   : > { %s1445_s18 = sand.u32 1, %s3380_s20   ;;  %p3382_p10 = scmp.ne.s32.totalorder %s3381_s22, 0 }
 0x312   : > { %s1446_s13 = scalar_lea.sflag [#allocation5], %s1445_s18 }
 0x313   : > { %p1840_p12 = pnand %p3383_p3, %p3382_p10 }
 0x315   : > { %2308 = dma.done.wait (!%p1840_p12), %s1446_s13, 4096  }
 0x316   : > { %2310 = vsyncadd (!%p1840_p12), %s1446_s13, 4294963200  ;;  %p24_p9 = scmp.ge.s32.totalorder %s2582_s29, 4   ;;  %s3384_s30 = smov %s2317_s10 }
 0x317   : > { %s3385_s10 = smov %s2321_s11  ;;  %s3386_s11 = smov %s2613_s16 }
 0x318   : > { %s3387_s12 = smov %s2582_s29  ;;  %26 = sbr.rel (!%p24_p9) target bundleno = 10 (0xa), region = 178 }
 0x31f   :  { %1451 = vsyncpa [#allocation4], 1 }
 0x320   :  { %1453 = vsyncpa [#allocation4 + $0x1], 1 }
 0x321   :  { %1454 = vsyncpa [#allocation7], 1 }
 0x322   :  { %1455 = vsyncpa [#allocation10], 1 }
 0x323   :  { %1456 = vsyncpa [#allocation5], 1 }
 0x324   :  { %1458 = vsyncpa [#allocation5 + $0x1], 1 }

</bundles_post_ra>
